<compile_context>
chip_gen: v5e
topology: v5e:2x2
jax: 0.10.0
libtpu: 0.0.40
codegen_flags: <defaults>
</compile_context>

<pallas_src>
import functools

import numpy as np
import jax
import jax.numpy as jnp
from jax import lax
from jax.experimental import pallas as pl
from jax.experimental.pallas import tpu as pltpu


def _tile(n, cap, multiple=1):
    """Largest tile for a dim of size n: n if it already fits under cap, else the largest
    divisor of n that is <= cap and a multiple of `multiple`; falls back to n (one full
    block) so the BlockSpec (8,128)-divisibility rules are always satisfied."""
    if n <= cap:
        return n
    for d in range(cap, 0, -1):
        if n % d == 0 and d % multiple == 0:
            return d
    return n


# ---------------- Pallas kernels (hot path) ----------------

def _conv_relu_pool_kernel(x_ref, w_ref, b_ref, m_ref, o_ref, *, wop1, l_rows):
    """Fused 3x3 conv (stride 1, pad 1) + bias + ReLU + 2x2/2 max-pool, one row tile.

    x_ref: (1, 1, LW, 4*Cin) bf16 combined-parity window of the zero-padded input:
           channel (2*pr+pc)*Cin + c at plane (row R, col C) == xp[2R+pr, 2C+pc, c],
           flattened row-major over (R, C), LW = (TPH+2)*WOP1 (2-row halo included).
    w_ref: (4, 16*Cin, Cout) bf16 -- one block-structured weight per 2x2 pool offset
           q = 2*dh+dw; block (s=2*rh+rw, parity 2*pr+pc) holds tap W[kh,kw] with
           kh = 2*rh+pr-dh, kw = 2*rw+pc-dw (zeros where out of range).
    b_ref: (1, Cout) f32 bias.
    m_ref: (L, 1) f32 -- 1.0 for real pooled columns, 0.0 for the per-row pad column.
    o_ref: (1, 1, L, Cout) bf16 pooled output, row j = ho*WOP1 + wo (col WO zeroed).
    """
    # One shared LHS for all four pool offsets: the 4 row/col-shifted windows
    # concatenated along K -> a single fat GEMM per pool offset (K = 16*Cin).
    lhs = jnp.concatenate(
        [x_ref[0, 0, pl.ds(rh * wop1 + rw, l_rows), :]
         for rh in (0, 1) for rw in (0, 1)], axis=-1)                 # (L, 16*Cin)
    pooled = jnp.dot(lhs, w_ref[0], preferred_element_type=jnp.float32)
    for q in range(1, 4):                                             # running 2x2 max
        pooled = jnp.maximum(
            pooled, jnp.dot(lhs, w_ref[q], preferred_element_type=jnp.float32))
    # bias + ReLU hoisted outside the pool max (monotone, same bias); pad column zeroed
    y = jnp.maximum(pooled + b_ref[...], 0.0) * m_ref[...]
    o_ref[0, 0] = y.astype(o_ref.dtype)


def _mlp_kernel(x_ref, w1_ref, b1_ref, w2_ref, b2_ref, o_ref, acc_ref):
    """classifier: Linear(F,128) -> ReLU -> (Dropout = identity in eval) -> Linear(128,NC).

    Grid = (K tiles OUTER, batch tiles inner): the big fc1 weight block only changes with
    the outer axis, so it streams through VMEM exactly once.  Per-batch-tile f32 partial
    sums persist in a VMEM scratch indexed by the batch-tile id; ReLU + fc2 run on the
    last contraction step only.
    """
    k = pl.program_id(0)
    b = pl.program_id(1)

    @pl.when(k == 0)
    def _():
        acc_ref[b] = jnp.zeros_like(acc_ref[b])

    acc_ref[b] = acc_ref[b] + jnp.dot(x_ref[...], w1_ref[...],
                                      preferred_element_type=jnp.float32)

    @pl.when(k == pl.num_programs(0) - 1)
    def _():
        h = jnp.maximum(acc_ref[b] + b1_ref[...], 0.0)
        # TODO(synk): nn.Dropout(0.5) is identity in eval mode; training-mode masking not implemented.
        o_ref[...] = (jnp.dot(h, w2_ref[...], preferred_element_type=jnp.float32)
                      + b2_ref[...]).astype(o_ref.dtype)


# ---------------- wrappers (layout plumbing only) ----------------

def conv_relu_pool(x, w4, b, *, has_pad_col=False):
    """maxpool2x2(relu(conv3x3_same(x) + b)) in NHWC via the fused Pallas kernel.

    x: (N, H, Wx, Cin).  If has_pad_col, the last column of x is an all-zero pad column
    produced by a previous conv_relu_pool call and is reused as this conv's right zero
    padding (no slice copy between layers).  Returns (N, H//2, W//2 + 1, Cout) bf16 whose
    last column is zeroed padding.
    """
    N, H, Wx, Cin = x.shape
    W = Wx - 1 if has_pad_col else Wx
    assert H % 2 == 0 and W % 2 == 0, "2x2/2 pooling requires even spatial dims"
    Cout = w4.shape[-1]
    HO, WO = H // 2, W // 2
    WOP1 = WO + 1

    TPH = _tile(HO, 64)                     # pooled rows per tile (blocks stay << 48 MiB)
    if N == 1 and HO // TPH == 1 and HO >= 2:
        TPH = _tile(HO, max(1, HO // 2))    # keep >=2 grid work units for v7x's two TCs
    T = HO // TPH
    LW = (TPH + 2) * WOP1                   # flattened plane rows per tile (incl. halo)
    L = TPH * WOP1                          # flattened pooled rows per tile

    # zero padding for the conv (pad=1); 2 extra bottom rows give every row tile its halo.
    pad_w = (1, 0) if has_pad_col else (1, 1)
    xp = jnp.pad(x.astype(jnp.bfloat16), ((0, 0), (1, 3), pad_w, (0, 0)))
    # space-to-depth into a single lane-dense combined-parity tensor:
    #   comb[n, R, C, (2*pr+pc)*Cin + c] = xp[n, 2R+pr, 2C+pc, c]
    comb = xp.reshape(N, HO + 2, 2, WOP1, 2, Cin).transpose(0, 1, 3, 2, 4, 5)
    comb = comb.reshape(N, HO + 2, WOP1, 4 * Cin)
    if T == 1:
        win = comb.reshape(N, 1, LW, 4 * Cin)           # free reshape, no window copy
    else:
        # TODO(synk): replace stacked halo windows with pl.ANY + in-kernel make_async_copy
        # halo fetches to avoid this extra HBM copy when T > 1.
        win = jnp.stack([comb[:, t * TPH: t * TPH + TPH + 2] for t in range(T)], axis=1)
        win = win.reshape(N, T, LW, 4 * Cin)

    # compile-time mask that zeroes the per-row pad column (col index WO of each WOP1 group)
    mask = jnp.asarray((np.arange(L) % WOP1 < WO).astype(np.float32).reshape(L, 1))

    win_spec = pl.BlockSpec((1, 1, LW, 4 * Cin), lambda n, t: (n, t, 0, 0))
    out = pl.pallas_call(
        functools.partial(_conv_relu_pool_kernel, wop1=WOP1, l_rows=L),
        out_shape=jax.ShapeDtypeStruct((N, T, L, Cout), jnp.bfloat16),
        grid=(N, T),
        in_specs=[win_spec,
                  pl.BlockSpec((4, 16 * Cin, Cout), lambda n, t: (0, 0, 0)),
                  pl.BlockSpec((1, Cout), lambda n, t: (0, 0)),
                  pl.BlockSpec((L, 1), lambda n, t: (0, 0))],
        out_specs=pl.BlockSpec((1, 1, L, Cout), lambda n, t: (n, t, 0, 0)),
        compiler_params=pltpu.CompilerParams(
            dimension_semantics=("parallel", "parallel"),
            vmem_limit_bytes=48 * 1024 * 1024),
    )(win, w4, b, mask)

    # row-major-compatible reshape back to (N, HO, WOP1, Cout); the zeroed pad column is
    # kept so neither the next conv layer nor the flatten needs a slice copy.
    return out.reshape(N, HO, WOP1, Cout)


def classifier(x_flat, w1, b1, w2, b2):
    N, F = x_flat.shape
    H1 = w1.shape[1]
    NC = w2.shape[1]
    TK = _tile(F, 7168, 128)   # fc1 contraction tile; 2*(TN*TK + TK*H1) bf16 blocks << 48 MiB
    KT = F // TK
    TN = _tile(N, 128, 8)      # batch tile (<=128 keeps v7x VMEM budget comfortable)
    NB = N // TN

    return pl.pallas_call(
        _mlp_kernel,
        out_shape=jax.ShapeDtypeStruct((N, NC), jnp.float32),
        grid=(KT, NB),         # reduction axis OUTER: fc1 weight streams exactly once
        in_specs=[
            pl.BlockSpec((TN, TK), lambda k, b: (b, k)),
            pl.BlockSpec((TK, H1), lambda k, b: (k, 0)),
            pl.BlockSpec((1, H1), lambda k, b: (0, 0)),
            pl.BlockSpec((H1, NC), lambda k, b: (0, 0)),
            pl.BlockSpec((1, NC), lambda k, b: (0, 0)),
        ],
        out_specs=pl.BlockSpec((TN, NC), lambda k, b: (b, 0)),
        scratch_shapes=[pltpu.VMEM((NB, TN, H1), jnp.float32)],
        compiler_params=pltpu.CompilerParams(
            dimension_semantics=("arbitrary", "parallel"),
            vmem_limit_bytes=48 * 1024 * 1024),
    )(x_flat.astype(jnp.bfloat16), w1, b1, w2, b2)


# ---------------- one-time parameter prep (outside the jitted forward) ----------------

def _fold_conv_weight(w_hwio):
    """(3,3,Cin,Cout) -> (4, 16*Cin, Cout): one block-structured GEMM weight per 2x2 pool
    offset q = 2*dh+dw, laid out to match the kernel's concatenated parity LHS."""
    Cin, Cout = int(w_hwio.shape[2]), int(w_hwio.shape[3])
    w4 = np.zeros((4, 16 * Cin, Cout), np.float32)
    for dh in range(2):
        for dw in range(2):
            q = 2 * dh + dw
            for rh in range(2):
                for rw in range(2):
                    for pr in range(2):
                        for pc in range(2):
                            kh = 2 * rh + pr - dh
                            kw = 2 * rw + pc - dw
                            if 0 <= kh <= 2 and 0 <= kw <= 2:
                                base = (2 * rh + rw) * 4 * Cin + (2 * pr + pc) * Cin
                                w4[q, base:base + Cin, :] = w_hwio[kh, kw]
    return w4


def prepare_params(params, feat_hw):
    """Fold conv weights, permute/expand fc1 rows to NHWC-flatten-with-pad-column order,
    and cast every GEMM operand to bf16 once, so the forward path does no weight work."""
    HO2, WO2 = feat_hw
    c1 = np.asarray(params["conv1_w"], np.float32)
    c2 = np.asarray(params["conv2_w"], np.float32)
    C = c2.shape[-1]
    H1 = int(params["fc1_w"].shape[1])
    w1 = np.asarray(params["fc1_w"], np.float32).reshape(C, HO2, WO2, H1)
    w1 = np.transpose(w1, (1, 2, 0, 3))                 # NCHW-flatten -> NHWC-flatten order
    w1 = np.pad(w1, ((0, 0), (0, 1), (0, 0), (0, 0)))   # zero rows at the conv pad column
    return {
        "conv1_w4": jnp.asarray(_fold_conv_weight(c1), jnp.bfloat16),
        "conv1_b": jnp.asarray(np.asarray(params["conv1_b"], np.float32).reshape(1, -1)),
        "conv2_w4": jnp.asarray(_fold_conv_weight(c2), jnp.bfloat16),
        "conv2_b": jnp.asarray(np.asarray(params["conv2_b"], np.float32).reshape(1, -1)),
        "fc1_w": jnp.asarray(w1.reshape(HO2 * (WO2 + 1) * C, H1), jnp.bfloat16),
        "fc1_b": jnp.asarray(np.asarray(params["fc1_b"], np.float32).reshape(1, -1)),
        "fc2_w": jnp.asarray(np.asarray(params["fc2_w"], np.float32)),
        "fc2_b": jnp.asarray(np.asarray(params["fc2_b"], np.float32).reshape(1, -1)),
    }


@jax.jit
def cnn_forward(x_nchw, params):
    N = x_nchw.shape[0]
    x = jnp.transpose(x_nchw, (0, 2, 3, 1))                         # NCHW -> NHWC once
    h = conv_relu_pool(x, params["conv1_w4"], params["conv1_b"])                  # (N,H/2,W/2+1,32)
    h = conv_relu_pool(h, params["conv2_w4"], params["conv2_b"], has_pad_col=True)  # (N,H/4,W/4+1,64)
    flat = h.reshape(N, -1)        # NHWC flatten incl. zeroed pad columns (fc1_w pre-expanded)
    return classifier(flat, params["fc1_w"], params["fc1_b"],
                      params["fc2_w"], params["fc2_b"])


# ---------------- pure-JAX reference for verification ----------------

def ref_forward(x_nchw, params):
    def conv_block(x, w_hwio, b):
        w_oihw = jnp.transpose(w_hwio, (3, 2, 0, 1))
        y = lax.conv_general_dilated(
            x, w_oihw, window_strides=(1, 1), padding=((1, 1), (1, 1)),
            dimension_numbers=("NCHW", "OIHW", "NCHW"),
            precision=lax.Precision.HIGHEST)
        y = jnp.maximum(y + b[None, :, None, None], 0.0)
        return lax.reduce_window(y, -jnp.inf, lax.max,
                                 (1, 1, 2, 2), (1, 1, 2, 2), "VALID")
    h = conv_block(x_nchw, params["conv1_w"], params["conv1_b"])
    h = conv_block(h, params["conv2_w"], params["conv2_b"])
    flat = h.reshape(h.shape[0], -1)                                # NCHW flatten, original fc1_w
    h = jnp.maximum(flat @ params["fc1_w"] + params["fc1_b"], 0.0)
    return h @ params["fc2_w"] + params["fc2_b"]


if __name__ == "__main__":
    key = jax.random.PRNGKey(0)
    ks = jax.random.split(key, 9)
    N, H, W = 2, 16, 16
    num_classes = 5
    # NOTE: the original module hard-codes fc1 in_features = 64*56*56 (224x224 inputs);
    # here spatial is scaled to 16x16, so fc1 in_features = 64*(H//4)*(W//4).
    F = 64 * (H // 4) * (W // 4)
    params = {
        "conv1_w": 0.1 * jax.random.normal(ks[0], (3, 3, 3, 32), jnp.float32),
        "conv1_b": 0.1 * jax.random.normal(ks[1], (32,), jnp.float32),
        "conv2_w": 0.1 * jax.random.normal(ks[2], (3, 3, 32, 64), jnp.float32),
        "conv2_b": 0.1 * jax.random.normal(ks[3], (64,), jnp.float32),
        "fc1_w": 0.05 * jax.random.normal(ks[4], (F, 128), jnp.float32),
        "fc1_b": 0.05 * jax.random.normal(ks[5], (128,), jnp.float32),
        "fc2_w": 0.1 * jax.random.normal(ks[6], (128, num_classes), jnp.float32),
        "fc2_b": 0.1 * jax.random.normal(ks[7], (num_classes,), jnp.float32),
    }
    x = jax.random.normal(ks[8], (N, 3, H, W), jnp.float32)

    kparams = prepare_params(params, (H // 4, W // 4))   # one-time weight folding / casting

    out = jax.block_until_ready(cnn_forward(x, kparams))
    ref = jax.block_until_ready(ref_forward(x, params))

    assert out.shape == (N, num_classes), out.shape
    assert jnp.allclose(out, ref, rtol=5e-2, atol=5e-2), (out, ref)
    print("KERNEL_OK")
</pallas_src>

<mosaic_0001>
module attributes {stable_mosaic.version = 11 : i64} {
  func.func @_conv_relu_pool_kernel(%arg0: i32, %arg1: i32, %arg2: memref<1x1x90x12xbf16, #tpu.memory_space<vmem>>, %arg3: memref<4x48x32xbf16, #tpu.memory_space<vmem>>, %arg4: memref<1x32xf32, #tpu.memory_space<vmem>>, %arg5: memref<72x1xf32, #tpu.memory_space<vmem>>, %arg6: memref<1x1x72x32xbf16, #tpu.memory_space<vmem>>) attributes {dimension_semantics = [#tpu.dimension_semantics<parallel>, #tpu.dimension_semantics<parallel>], iteration_bounds = array<i64: 2, 1>, scalar_prefetch = 0 : i64, scratch_operands = 0 : i64, tpu.core_type = #tpu.core_type<tc>, window_params = [{transform_indices = @transform_0, window_bounds = array<i64: 1, 1, 90, 12>}, {pipeline_mode = #tpu.pipeline_mode<synchronous>, transform_indices = @transform_1, window_bounds = array<i64: 4, 48, 32>}, {pipeline_mode = #tpu.pipeline_mode<synchronous>, transform_indices = @transform_2, window_bounds = array<i64: 1, 32>}, {pipeline_mode = #tpu.pipeline_mode<synchronous>, transform_indices = @transform_3, window_bounds = array<i64: 72, 1>}, {transform_indices = @transform_4, window_bounds = array<i64: 1, 1, 72, 32>}]} {
    %c0 = arith.constant 0 : index
    %c0_0 = arith.constant 0 : index
    %c0_1 = arith.constant 0 : index
    %c0_2 = arith.constant 0 : index
    %0 = vector.load %arg2[%c0, %c0_0, %c0_1, %c0_2] : memref<1x1x90x12xbf16, #tpu.memory_space<vmem>>, vector<1x1x72x12xbf16>
    %1 = vector.shape_cast %0 : vector<1x1x72x12xbf16> to vector<72x12xbf16>
    %c0_3 = arith.constant 0 : index
    %c0_4 = arith.constant 0 : index
    %c1 = arith.constant 1 : index
    %c0_5 = arith.constant 0 : index
    %2 = vector.load %arg2[%c0_3, %c0_4, %c1, %c0_5] : memref<1x1x90x12xbf16, #tpu.memory_space<vmem>>, vector<1x1x72x12xbf16>
    %3 = vector.shape_cast %2 : vector<1x1x72x12xbf16> to vector<72x12xbf16>
    %c0_6 = arith.constant 0 : index
    %c0_7 = arith.constant 0 : index
    %c9 = arith.constant 9 : index
    %c0_8 = arith.constant 0 : index
    %4 = vector.load %arg2[%c0_6, %c0_7, %c9, %c0_8] : memref<1x1x90x12xbf16, #tpu.memory_space<vmem>>, vector<1x1x72x12xbf16>
    %5 = vector.shape_cast %4 : vector<1x1x72x12xbf16> to vector<72x12xbf16>
    %c0_9 = arith.constant 0 : index
    %c0_10 = arith.constant 0 : index
    %c10 = arith.constant 10 : index
    %c0_11 = arith.constant 0 : index
    %6 = vector.load %arg2[%c0_9, %c0_10, %c10, %c0_11] : memref<1x1x90x12xbf16, #tpu.memory_space<vmem>>, vector<1x1x72x12xbf16>
    %7 = vector.shape_cast %6 : vector<1x1x72x12xbf16> to vector<72x12xbf16>
    %8 = tpu.concatenate %1, %3, %5, %7 in 1 : vector<72x12xbf16>, vector<72x12xbf16>, vector<72x12xbf16>, vector<72x12xbf16> -> vector<72x48xbf16>
    %c0_12 = arith.constant 0 : index
    %c0_13 = arith.constant 0 : index
    %c0_14 = arith.constant 0 : index
    %9 = vector.load %arg3[%c0_12, %c0_13, %c0_14] : memref<4x48x32xbf16, #tpu.memory_space<vmem>>, vector<1x48x32xbf16>
    %10 = vector.shape_cast %9 : vector<1x48x32xbf16> to vector<48x32xbf16>
    %cst = arith.constant dense<0.000000e+00> : vector<72x32xf32>
    %11 = tpu.matmul %8, %10, %cst {dimension_numbers = #tpu.dot_dimension_numbers<[1], [0], [0], [1], [0, 0, 1, 1], [], []>} : vector<72x48xbf16>, vector<48x32xbf16>, vector<72x32xf32> -> vector<72x32xf32>
    %c1_15 = arith.constant 1 : index
    %c0_16 = arith.constant 0 : index
    %c0_17 = arith.constant 0 : index
    %12 = vector.load %arg3[%c1_15, %c0_16, %c0_17] : memref<4x48x32xbf16, #tpu.memory_space<vmem>>, vector<1x48x32xbf16>
    %13 = vector.shape_cast %12 : vector<1x48x32xbf16> to vector<48x32xbf16>
    %cst_18 = arith.constant dense<0.000000e+00> : vector<72x32xf32>
    %14 = tpu.matmul %8, %13, %cst_18 {dimension_numbers = #tpu.dot_dimension_numbers<[1], [0], [0], [1], [0, 0, 1, 1], [], []>} : vector<72x48xbf16>, vector<48x32xbf16>, vector<72x32xf32> -> vector<72x32xf32>
    %15 = arith.maximumf %11, %14 : vector<72x32xf32>
    %c2 = arith.constant 2 : index
    %c0_19 = arith.constant 0 : index
    %c0_20 = arith.constant 0 : index
    %16 = vector.load %arg3[%c2, %c0_19, %c0_20] : memref<4x48x32xbf16, #tpu.memory_space<vmem>>, vector<1x48x32xbf16>
    %17 = vector.shape_cast %16 : vector<1x48x32xbf16> to vector<48x32xbf16>
    %cst_21 = arith.constant dense<0.000000e+00> : vector<72x32xf32>
    %18 = tpu.matmul %8, %17, %cst_21 {dimension_numbers = #tpu.dot_dimension_numbers<[1], [0], [0], [1], [0, 0, 1, 1], [], []>} : vector<72x48xbf16>, vector<48x32xbf16>, vector<72x32xf32> -> vector<72x32xf32>
    %19 = arith.maximumf %15, %18 : vector<72x32xf32>
    %c3 = arith.constant 3 : index
    %c0_22 = arith.constant 0 : index
    %c0_23 = arith.constant 0 : index
    %20 = vector.load %arg3[%c3, %c0_22, %c0_23] : memref<4x48x32xbf16, #tpu.memory_space<vmem>>, vector<1x48x32xbf16>
    %21 = vector.shape_cast %20 : vector<1x48x32xbf16> to vector<48x32xbf16>
    %cst_24 = arith.constant dense<0.000000e+00> : vector<72x32xf32>
    %22 = tpu.matmul %8, %21, %cst_24 {dimension_numbers = #tpu.dot_dimension_numbers<[1], [0], [0], [1], [0, 0, 1, 1], [], []>} : vector<72x48xbf16>, vector<48x32xbf16>, vector<72x32xf32> -> vector<72x32xf32>
    %23 = arith.maximumf %19, %22 : vector<72x32xf32>
    %c0_25 = arith.constant 0 : index
    %c0_26 = arith.constant 0 : index
    %24 = vector.load %arg4[%c0_25, %c0_26] : memref<1x32xf32, #tpu.memory_space<vmem>>, vector<1x32xf32>
    %25 = vector.broadcast %24 : vector<1x32xf32> to vector<72x32xf32>
    %26 = arith.addf %23, %25 : vector<72x32xf32>
    %cst_27 = arith.constant 0.000000e+00 : f32
    %27 = vector.broadcast %cst_27 : f32 to vector<72x32xf32>
    %28 = arith.maximumf %26, %27 : vector<72x32xf32>
    %c0_28 = arith.constant 0 : index
    %c0_29 = arith.constant 0 : index
    %29 = vector.load %arg5[%c0_28, %c0_29] : memref<72x1xf32, #tpu.memory_space<vmem>>, vector<72x1xf32>
    %30 = vector.broadcast %29 : vector<72x1xf32> to vector<72x32xf32>
    %31 = arith.mulf %28, %30 : vector<72x32xf32>
    %32 = arith.truncf %31 : vector<72x32xf32> to vector<72x32xbf16>
    %c0_30 = arith.constant 0 : index
    %c0_31 = arith.constant 0 : index
    %c0_32 = arith.constant 0 : index
    %c0_33 = arith.constant 0 : index
    %33 = vector.load %arg6[%c0_30, %c0_31, %c0_32, %c0_33] : memref<1x1x72x32xbf16, #tpu.memory_space<vmem>>, vector<1x1x72x32xbf16>
    %34 = vector.shape_cast %33 : vector<1x1x72x32xbf16> to vector<72x32xbf16>
    %35 = vector.shape_cast %32 : vector<72x32xbf16> to vector<1x1x72x32xbf16>
    tpu.vector_store %arg6[%c0_30, %c0_31, %c0_32, %c0_33], %35 {strides = array<i32>} : memref<1x1x72x32xbf16, #tpu.memory_space<vmem>>, vector<1x1x72x32xbf16>,
    return
  }
  func.func @transform_0(%arg0: i32, %arg1: i32) -> (i32, i32, i32, i32) {
    %c0_i32 = arith.constant 0 : i32
    %c0_i32_0 = arith.constant 0 : i32
    %c0_i32_1 = arith.constant 0 : i32
    return %arg0, %arg1, %c0_i32, %c0_i32_0 : i32, i32, i32, i32
  }
  func.func @transform_1(%arg0: i32, %arg1: i32) -> (i32, i32, i32) {
    %c0_i32 = arith.constant 0 : i32
    %c0_i32_0 = arith.constant 0 : i32
    %c0_i32_1 = arith.constant 0 : i32
    %c0_i32_2 = arith.constant 0 : i32
    return %c0_i32, %c0_i32_0, %c0_i32_1 : i32, i32, i32
  }
  func.func @transform_2(%arg0: i32, %arg1: i32) -> (i32, i32) {
    %c0_i32 = arith.constant 0 : i32
    %c0_i32_0 = arith.constant 0 : i32
    %c0_i32_1 = arith.constant 0 : i32
    return %c0_i32, %c0_i32_0 : i32, i32
  }
  func.func @transform_3(%arg0: i32, %arg1: i32) -> (i32, i32) {
    %c0_i32 = arith.constant 0 : i32
    %c0_i32_0 = arith.constant 0 : i32
    %c0_i32_1 = arith.constant 0 : i32
    return %c0_i32, %c0_i32_0 : i32, i32
  }
  func.func @transform_4(%arg0: i32, %arg1: i32) -> (i32, i32, i32, i32) {
    %c0_i32 = arith.constant 0 : i32
    %c0_i32_0 = arith.constant 0 : i32
    %c0_i32_1 = arith.constant 0 : i32
    return %arg0, %arg1, %c0_i32, %c0_i32_0 : i32, i32, i32, i32
  }
}

module attributes {stable_mosaic.version = 11 : i64} {
  func.func @_conv_relu_pool_kernel(%arg0: i32, %arg1: i32, %arg2: memref<1x1x30x128xbf16, #tpu.memory_space<vmem>>, %arg3: memref<4x512x64xbf16, #tpu.memory_space<vmem>>, %arg4: memref<1x64xf32, #tpu.memory_space<vmem>>, %arg5: memref<20x1xf32, #tpu.memory_space<vmem>>, %arg6: memref<1x1x20x64xbf16, #tpu.memory_space<vmem>>) attributes {dimension_semantics = [#tpu.dimension_semantics<parallel>, #tpu.dimension_semantics<parallel>], iteration_bounds = array<i64: 2, 1>, scalar_prefetch = 0 : i64, scratch_operands = 0 : i64, tpu.core_type = #tpu.core_type<tc>, window_params = [{transform_indices = @transform_0, window_bounds = array<i64: 1, 1, 30, 128>}, {pipeline_mode = #tpu.pipeline_mode<synchronous>, transform_indices = @transform_1, window_bounds = array<i64: 4, 512, 64>}, {pipeline_mode = #tpu.pipeline_mode<synchronous>, transform_indices = @transform_2, window_bounds = array<i64: 1, 64>}, {pipeline_mode = #tpu.pipeline_mode<synchronous>, transform_indices = @transform_3, window_bounds = array<i64: 20, 1>}, {transform_indices = @transform_4, window_bounds = array<i64: 1, 1, 20, 64>}]} {
    %c0 = arith.constant 0 : index
    %c0_0 = arith.constant 0 : index
    %c0_1 = arith.constant 0 : index
    %c0_2 = arith.constant 0 : index
    %0 = vector.load %arg2[%c0, %c0_0, %c0_1, %c0_2] : memref<1x1x30x128xbf16, #tpu.memory_space<vmem>>, vector<1x1x20x128xbf16>
    %1 = vector.shape_cast %0 : vector<1x1x20x128xbf16> to vector<20x128xbf16>
    %c0_3 = arith.constant 0 : index
    %c0_4 = arith.constant 0 : index
    %c1 = arith.constant 1 : index
    %c0_5 = arith.constant 0 : index
    %2 = vector.load %arg2[%c0_3, %c0_4, %c1, %c0_5] : memref<1x1x30x128xbf16, #tpu.memory_space<vmem>>, vector<1x1x20x128xbf16>
    %3 = vector.shape_cast %2 : vector<1x1x20x128xbf16> to vector<20x128xbf16>
    %c0_6 = arith.constant 0 : index
    %c0_7 = arith.constant 0 : index
    %c5 = arith.constant 5 : index
    %c0_8 = arith.constant 0 : index
    %4 = vector.load %arg2[%c0_6, %c0_7, %c5, %c0_8] : memref<1x1x30x128xbf16, #tpu.memory_space<vmem>>, vector<1x1x20x128xbf16>
    %5 = vector.shape_cast %4 : vector<1x1x20x128xbf16> to vector<20x128xbf16>
    %c0_9 = arith.constant 0 : index
    %c0_10 = arith.constant 0 : index
    %c6 = arith.constant 6 : index
    %c0_11 = arith.constant 0 : index
    %6 = vector.load %arg2[%c0_9, %c0_10, %c6, %c0_11] : memref<1x1x30x128xbf16, #tpu.memory_space<vmem>>, vector<1x1x20x128xbf16>
    %7 = vector.shape_cast %6 : vector<1x1x20x128xbf16> to vector<20x128xbf16>
    %8 = tpu.concatenate %1, %3, %5, %7 in 1 : vector<20x128xbf16>, vector<20x128xbf16>, vector<20x128xbf16>, vector<20x128xbf16> -> vector<20x512xbf16>
    %c0_12 = arith.constant 0 : index
    %c0_13 = arith.constant 0 : index
    %c0_14 = arith.constant 0 : index
    %9 = vector.load %arg3[%c0_12, %c0_13, %c0_14] : memref<4x512x64xbf16, #tpu.memory_space<vmem>>, vector<1x512x64xbf16>
    %10 = vector.shape_cast %9 : vector<1x512x64xbf16> to vector<512x64xbf16>
    %cst = arith.constant dense<0.000000e+00> : vector<20x64xf32>
    %11 = tpu.matmul %8, %10, %cst {dimension_numbers = #tpu.dot_dimension_numbers<[1], [0], [0], [1], [0, 0, 1, 1], [], []>} : vector<20x512xbf16>, vector<512x64xbf16>, vector<20x64xf32> -> vector<20x64xf32>
    %c1_15 = arith.constant 1 : index
    %c0_16 = arith.constant 0 : index
    %c0_17 = arith.constant 0 : index
    %12 = vector.load %arg3[%c1_15, %c0_16, %c0_17] : memref<4x512x64xbf16, #tpu.memory_space<vmem>>, vector<1x512x64xbf16>
    %13 = vector.shape_cast %12 : vector<1x512x64xbf16> to vector<512x64xbf16>
    %cst_18 = arith.constant dense<0.000000e+00> : vector<20x64xf32>
    %14 = tpu.matmul %8, %13, %cst_18 {dimension_numbers = #tpu.dot_dimension_numbers<[1], [0], [0], [1], [0, 0, 1, 1], [], []>} : vector<20x512xbf16>, vector<512x64xbf16>, vector<20x64xf32> -> vector<20x64xf32>
    %15 = arith.maximumf %11, %14 : vector<20x64xf32>
    %c2 = arith.constant 2 : index
    %c0_19 = arith.constant 0 : index
    %c0_20 = arith.constant 0 : index
    %16 = vector.load %arg3[%c2, %c0_19, %c0_20] : memref<4x512x64xbf16, #tpu.memory_space<vmem>>, vector<1x512x64xbf16>
    %17 = vector.shape_cast %16 : vector<1x512x64xbf16> to vector<512x64xbf16>
    %cst_21 = arith.constant dense<0.000000e+00> : vector<20x64xf32>
    %18 = tpu.matmul %8, %17, %cst_21 {dimension_numbers = #tpu.dot_dimension_numbers<[1], [0], [0], [1], [0, 0, 1, 1], [], []>} : vector<20x512xbf16>, vector<512x64xbf16>, vector<20x64xf32> -> vector<20x64xf32>
    %19 = arith.maximumf %15, %18 : vector<20x64xf32>
    %c3 = arith.constant 3 : index
    %c0_22 = arith.constant 0 : index
    %c0_23 = arith.constant 0 : index
    %20 = vector.load %arg3[%c3, %c0_22, %c0_23] : memref<4x512x64xbf16, #tpu.memory_space<vmem>>, vector<1x512x64xbf16>
    %21 = vector.shape_cast %20 : vector<1x512x64xbf16> to vector<512x64xbf16>
    %cst_24 = arith.constant dense<0.000000e+00> : vector<20x64xf32>
    %22 = tpu.matmul %8, %21, %cst_24 {dimension_numbers = #tpu.dot_dimension_numbers<[1], [0], [0], [1], [0, 0, 1, 1], [], []>} : vector<20x512xbf16>, vector<512x64xbf16>, vector<20x64xf32> -> vector<20x64xf32>
    %23 = arith.maximumf %19, %22 : vector<20x64xf32>
    %c0_25 = arith.constant 0 : index
    %c0_26 = arith.constant 0 : index
    %24 = vector.load %arg4[%c0_25, %c0_26] : memref<1x64xf32, #tpu.memory_space<vmem>>, vector<1x64xf32>
    %25 = vector.broadcast %24 : vector<1x64xf32> to vector<20x64xf32>
    %26 = arith.addf %23, %25 : vector<20x64xf32>
    %cst_27 = arith.constant 0.000000e+00 : f32
    %27 = vector.broadcast %cst_27 : f32 to vector<20x64xf32>
    %28 = arith.maximumf %26, %27 : vector<20x64xf32>
    %c0_28 = arith.constant 0 : index
    %c0_29 = arith.constant 0 : index
    %29 = vector.load %arg5[%c0_28, %c0_29] : memref<20x1xf32, #tpu.memory_space<vmem>>, vector<20x1xf32>
    %30 = vector.broadcast %29 : vector<20x1xf32> to vector<20x64xf32>
    %31 = arith.mulf %28, %30 : vector<20x64xf32>
    %32 = arith.truncf %31 : vector<20x64xf32> to vector<20x64xbf16>
    %c0_30 = arith.constant 0 : index
    %c0_31 = arith.constant 0 : index
    %c0_32 = arith.constant 0 : index
    %c0_33 = arith.constant 0 : index
    %33 = vector.load %arg6[%c0_30, %c0_31, %c0_32, %c0_33] : memref<1x1x20x64xbf16, #tpu.memory_space<vmem>>, vector<1x1x20x64xbf16>
    %34 = vector.shape_cast %33 : vector<1x1x20x64xbf16> to vector<20x64xbf16>
    %35 = vector.shape_cast %32 : vector<20x64xbf16> to vector<1x1x20x64xbf16>
    tpu.vector_store %arg6[%c0_30, %c0_31, %c0_32, %c0_33], %35 {strides = array<i32>} : memref<1x1x20x64xbf16, #tpu.memory_space<vmem>>, vector<1x1x20x64xbf16>,
    return
  }
  func.func @transform_0(%arg0: i32, %arg1: i32) -> (i32, i32, i32, i32) {
    %c0_i32 = arith.constant 0 : i32
    %c0_i32_0 = arith.constant 0 : i32
    %c0_i32_1 = arith.constant 0 : i32
    return %arg0, %arg1, %c0_i32, %c0_i32_0 : i32, i32, i32, i32
  }
  func.func @transform_1(%arg0: i32, %arg1: i32) -> (i32, i32, i32) {
    %c0_i32 = arith.constant 0 : i32
    %c0_i32_0 = arith.constant 0 : i32
    %c0_i32_1 = arith.constant 0 : i32
    %c0_i32_2 = arith.constant 0 : i32
    return %c0_i32, %c0_i32_0, %c0_i32_1 : i32, i32, i32
  }
  func.func @transform_2(%arg0: i32, %arg1: i32) -> (i32, i32) {
    %c0_i32 = arith.constant 0 : i32
    %c0_i32_0 = arith.constant 0 : i32
    %c0_i32_1 = arith.constant 0 : i32
    return %c0_i32, %c0_i32_0 : i32, i32
  }
  func.func @transform_3(%arg0: i32, %arg1: i32) -> (i32, i32) {
    %c0_i32 = arith.constant 0 : i32
    %c0_i32_0 = arith.constant 0 : i32
    %c0_i32_1 = arith.constant 0 : i32
    return %c0_i32, %c0_i32_0 : i32, i32
  }
  func.func @transform_4(%arg0: i32, %arg1: i32) -> (i32, i32, i32, i32) {
    %c0_i32 = arith.constant 0 : i32
    %c0_i32_0 = arith.constant 0 : i32
    %c0_i32_1 = arith.constant 0 : i32
    return %arg0, %arg1, %c0_i32, %c0_i32_0 : i32, i32, i32, i32
  }
}

module attributes {stable_mosaic.version = 11 : i64} {
  func.func @_mlp_kernel(%arg0: i32, %arg1: i32, %arg2: memref<2x1280xbf16, #tpu.memory_space<vmem>>, %arg3: memref<1280x128xbf16, #tpu.memory_space<vmem>>, %arg4: memref<1x128xf32, #tpu.memory_space<vmem>>, %arg5: memref<128x5xf32, #tpu.memory_space<vmem>>, %arg6: memref<1x5xf32, #tpu.memory_space<vmem>>, %arg7: memref<2x5xf32, #tpu.memory_space<vmem>>, %arg8: memref<1x2x128xf32, #tpu.memory_space<vmem>>) attributes {dimension_semantics = [#tpu.dimension_semantics<arbitrary>, #tpu.dimension_semantics<parallel>], iteration_bounds = array<i64: 1, 1>, scalar_prefetch = 0 : i64, scratch_operands = 1 : i64, tpu.core_type = #tpu.core_type<tc>, window_params = [{transform_indices = @transform_0, window_bounds = array<i64: 2, 1280>}, {transform_indices = @transform_1, window_bounds = array<i64: 1280, 128>}, {pipeline_mode = #tpu.pipeline_mode<synchronous>, transform_indices = @transform_2, window_bounds = array<i64: 1, 128>}, {pipeline_mode = #tpu.pipeline_mode<synchronous>, transform_indices = @transform_3, window_bounds = array<i64: 128, 5>}, {pipeline_mode = #tpu.pipeline_mode<synchronous>, transform_indices = @transform_4, window_bounds = array<i64: 1, 5>}, {transform_indices = @transform_5, window_bounds = array<i64: 2, 5>}]} {
    %c0_i32 = arith.constant 0 : i32
    %0 = arith.cmpi eq, %arg0, %c0_i32 : i32
    %1 = arith.extui %0 : i1 to i32
    %c0_i32_0 = arith.constant 0 : i32
    %2 = arith.cmpi ne, %1, %c0_i32_0 : i32
    scf.if %2 {
      %cst_10 = arith.constant 0.000000e+00 : f32
      %17 = vector.broadcast %cst_10 : f32 to vector<2x128xf32>
      %18 = arith.index_cast %arg1 : i32 to index
      %c0_11 = arith.constant 0 : index
      %c0_12 = arith.constant 0 : index
      %19 = vector.load %arg8[%18, %c0_11, %c0_12] : memref<1x2x128xf32, #tpu.memory_space<vmem>>, vector<1x2x128xf32>
      %20 = vector.shape_cast %19 : vector<1x2x128xf32> to vector<2x128xf32>
      %21 = vector.shape_cast %17 : vector<2x128xf32> to vector<1x2x128xf32>
      tpu.vector_store %arg8[%18, %c0_11, %c0_12], %21 {strides = array<i32>} : memref<1x2x128xf32, #tpu.memory_space<vmem>>, vector<1x2x128xf32>,
    } else {
    }
    %3 = arith.index_cast %arg1 : i32 to index
    %c0 = arith.constant 0 : index
    %c0_1 = arith.constant 0 : index
    %4 = vector.load %arg8[%3, %c0, %c0_1] : memref<1x2x128xf32, #tpu.memory_space<vmem>>, vector<1x2x128xf32>
    %5 = vector.shape_cast %4 : vector<1x2x128xf32> to vector<2x128xf32>
    %c0_2 = arith.constant 0 : index
    %c0_3 = arith.constant 0 : index
    %6 = vector.load %arg2[%c0_2, %c0_3] : memref<2x1280xbf16, #tpu.memory_space<vmem>>, vector<2x1280xbf16>
    %c0_4 = arith.constant 0 : index
    %c0_5 = arith.constant 0 : index
    %7 = vector.load %arg3[%c0_4, %c0_5] : memref<1280x128xbf16, #tpu.memory_space<vmem>>, vector<1280x128xbf16>
    %cst = arith.constant dense<0.000000e+00> : vector<2x128xf32>
    %8 = tpu.matmul %6, %7, %cst {dimension_numbers = #tpu.dot_dimension_numbers<[1], [0], [0], [1], [0, 0, 1, 1], [], []>} : vector<2x1280xbf16>, vector<1280x128xbf16>, vector<2x128xf32> -> vector<2x128xf32>
    %9 = arith.addf %5, %8 : vector<2x128xf32>
    %10 = arith.index_cast %arg1 : i32 to index
    %c0_6 = arith.constant 0 : index
    %c0_7 = arith.constant 0 : index
    %11 = vector.load %arg8[%10, %c0_6, %c0_7] : memref<1x2x128xf32, #tpu.memory_space<vmem>>, vector<1x2x128xf32>
    %12 = vector.shape_cast %11 : vector<1x2x128xf32> to vector<2x128xf32>
    %13 = vector.shape_cast %9 : vector<2x128xf32> to vector<1x2x128xf32>
    tpu.vector_store %arg8[%10, %c0_6, %c0_7], %13 {strides = array<i32>} : memref<1x2x128xf32, #tpu.memory_space<vmem>>, vector<1x2x128xf32>,
    %c0_i32_8 = arith.constant 0 : i32
    %14 = arith.cmpi eq, %arg0, %c0_i32_8 : i32
    %15 = arith.extui %14 : i1 to i32
    %c0_i32_9 = arith.constant 0 : i32
    %16 = arith.cmpi ne, %15, %c0_i32_9 : i32
    scf.if %16 {
      %17 = arith.index_cast %arg1 : i32 to index
      %c0_10 = arith.constant 0 : index
      %c0_11 = arith.constant 0 : index
      %18 = vector.load %arg8[%17, %c0_10, %c0_11] : memref<1x2x128xf32, #tpu.memory_space<vmem>>, vector<1x2x128xf32>
      %19 = vector.shape_cast %18 : vector<1x2x128xf32> to vector<2x128xf32>
      %c0_12 = arith.constant 0 : index
      %c0_13 = arith.constant 0 : index
      %20 = vector.load %arg4[%c0_12, %c0_13] : memref<1x128xf32, #tpu.memory_space<vmem>>, vector<1x128xf32>
      %21 = vector.broadcast %20 : vector<1x128xf32> to vector<2x128xf32>
      %22 = arith.addf %19, %21 : vector<2x128xf32>
      %cst_14 = arith.constant 0.000000e+00 : f32
      %23 = vector.broadcast %cst_14 : f32 to vector<2x128xf32>
      %24 = arith.maximumf %22, %23 : vector<2x128xf32>
      %c0_15 = arith.constant 0 : index
      %c0_16 = arith.constant 0 : index
      %25 = vector.load %arg5[%c0_15, %c0_16] : memref<128x5xf32, #tpu.memory_space<vmem>>, vector<128x5xf32>
      %cst_17 = arith.constant dense<0.000000e+00> : vector<2x5xf32>
      %26 = tpu.matmul %24, %25, %cst_17 {dimension_numbers = #tpu.dot_dimension_numbers<[1], [0], [0], [1], [0, 0, 1, 1], [], []>} : vector<2x128xf32>, vector<128x5xf32>, vector<2x5xf32> -> vector<2x5xf32>
      %c0_18 = arith.constant 0 : index
      %c0_19 = arith.constant 0 : index
      %27 = vector.load %arg6[%c0_18, %c0_19] : memref<1x5xf32, #tpu.memory_space<vmem>>, vector<1x5xf32>
      %28 = vector.broadcast %27 : vector<1x5xf32> to vector<2x5xf32>
      %29 = arith.addf %26, %28 : vector<2x5xf32>
      %c0_20 = arith.constant 0 : index
      %c0_21 = arith.constant 0 : index
      %30 = vector.load %arg7[%c0_20, %c0_21] : memref<2x5xf32, #tpu.memory_space<vmem>>, vector<2x5xf32>
      tpu.vector_store %arg7[%c0_20, %c0_21], %29 {strides = array<i32>} : memref<2x5xf32, #tpu.memory_space<vmem>>, vector<2x5xf32>,
    } else {
    }
    return
  }
  func.func @transform_0(%arg0: i32, %arg1: i32) -> (i32, i32) {
    %c0_i32 = arith.constant 0 : i32
    return %arg1, %arg0 : i32, i32
  }
  func.func @transform_1(%arg0: i32, %arg1: i32) -> (i32, i32) {
    %c0_i32 = arith.constant 0 : i32
    %c0_i32_0 = arith.constant 0 : i32
    return %arg0, %c0_i32 : i32, i32
  }
  func.func @transform_2(%arg0: i32, %arg1: i32) -> (i32, i32) {
    %c0_i32 = arith.constant 0 : i32
    %c0_i32_0 = arith.constant 0 : i32
    %c0_i32_1 = arith.constant 0 : i32
    return %c0_i32, %c0_i32_0 : i32, i32
  }
  func.func @transform_3(%arg0: i32, %arg1: i32) -> (i32, i32) {
    %c0_i32 = arith.constant 0 : i32
    %c0_i32_0 = arith.constant 0 : i32
    %c0_i32_1 = arith.constant 0 : i32
    return %c0_i32, %c0_i32_0 : i32, i32
  }
  func.func @transform_4(%arg0: i32, %arg1: i32) -> (i32, i32) {
    %c0_i32 = arith.constant 0 : i32
    %c0_i32_0 = arith.constant 0 : i32
    %c0_i32_1 = arith.constant 0 : i32
    return %c0_i32, %c0_i32_0 : i32, i32
  }
  func.func @transform_5(%arg0: i32, %arg1: i32) -> (i32, i32) {
    %c0_i32 = arith.constant 0 : i32
    %c0_i32_0 = arith.constant 0 : i32
    return %arg1, %c0_i32 : i32, i32
  }
}

</mosaic_0001>

<bundles_post_ra>
// kernel: cnn_forward.3
= control target key start
LH: loop header
LB: loop body
LE: loop exit
PB: predicated region body
PF: predicated region fallthrough
CT: control target
= control target key end

     0   :  { %s1136_s15 = smov 0   ;;  %s1138_s16 = smov 0   ;;  %s1384_s0 = inlined_call_operand.vmem [shape: bf16[2,1,90,12], index: 0, kind: input, shape index: {}]   ;;  %s1385_s1 = inlined_call_operand.vmem [shape: bf16[4,48,32], index: 1, kind: input, shape index: {}]   ;;  %s1386_s2 = inlined_call_operand.vmem [shape: f32[1,32], index: 2, kind: input, shape index: {}]   ;;  %s1387_s3 = inlined_call_operand.vmem [shape: f32[72,1], index: 3, kind: input, shape index: {}]   ;;  %s1388_s4 = inlined_call_operand.vmem [shape: bf16[2,1,72,32], index: 4, kind: output, shape index: {}]  }
   0x1   :  { %s1140_s17 = smov 0  }
   0x2 LB: > { %s26_s18 = sadd.s32 1, %s1101_s16  ;;  %p908_p0 = scmp.ge.s32.totalorder %s1105_s17, 1  ;;  %s1105_s17 = sphi %s1140_s17, %s14_s17   ;;  %s1101_s16 = sphi %s1138_s16, %s1390_s16   ;;  %s1097_s15 = sphi %s1136_s15, %s1389_s15  }
   0x3   : > { %p28_p1 = scmp.ge.s32.totalorder %s26_s18, 2  ;;  %p182_p2 = scmp.lt.s32.totalorder %s1105_s17, 3 }
   0x5   : > { %s1392_s18 = smov (%p28_p1, %s26_s18), 0  ;;  %p183_p3 = pnand %p908_p0, %p182_p2 }
   0x6   : > { %p216_p4 = scmp.lt.s32.totalorder (!%p183_p3), %s1097_s15, 1  ;;  %s1107_s23 = smov (!%p183_p3), 12  }
   0x7   : > { %186 = sbr.rel (%p183_p3) target bundleno = 359 (0x167), region = 36  ;;  %s1108_s24 = smov (!%p183_p3), 36  }
   0x8   : > { %s1109_s25 = smov (!%p183_p3), 24  }
   0xc   : > { %s1394_s15 = smov (!%p216_p4, %s1097_s15), 1  ;;  %vm274_vm0 = vsmask.f32 7424  ;;  %vm385_vm1 = vcmask 1046528   ;;  %v1006_v41 = vld [vmem:[%s1385_s1 + $0x10] sm:$0xff]  ;;  %v1009_v42 = vld [vmem:[%s1385_s1 + $0x28] sm:$0xff] }
   0xd   : > { %s1049_s19 = smul.u32 48, %s1394_s15  ;;  %v1012_v43 = vld [vmem:[%s1385_s1 + $0x40] sm:$0xff]  ;;  %v1015_v46 = vld [vmem:[%s1385_s1 + $0x58] sm:$0xff]  ;;  %479 = vmatpush.bf16.msra.mxu0 %v1006_v41  ;;  %537 = vmatpush.bf16.msra.mxu1 %v1009_v42  ;;  %vm405_vm2 = vcmask 97280   ;;  %vm417_vm3 = vcmask 195584   ;;  %vm428_vm4 = vcmask 293888  }
   0xe   : > { %604 = vmatpush.bf16.msra.mxu2 %v1012_v43  ;;  %671 = vmatpush.bf16.msra.mxu3 %v1015_v46  ;;  %vm463_vm5 = vcmask 392192   ;;  %s1050_s26 = smul.u32 36, %s1394_s15  ;;  %vm802_vm6 = vcmask 257024  }
   0xf   : > { %s1160_s22 = scalar_lea.vmem %s1384_s0, %s1049_s19 }
  0x10   : > { %v1163_v0 = vld [vmem:[%s1160_s22] sm:$0xff]   ;;  %v1166_v1 = vld [vmem:[%s1160_s22 + $0x8] sm:$0xff]   ;;  %v1179_v11 = vld [vmem:[%s1160_s22 + $0x10] sm:$0xff]   ;;  %s1347_s29 = scalar_lea.vmem %s1388_s4, %s1050_s26 }
  0x11   : > { %v1169_v2 = vld [vmem:[%s1160_s22 + $0xc] sm:$0xff]   ;;  %v276_v3 = vshrl.u32 %v1163_v0, 16  ;;  %v278_v4 = vshll.u32 %v1163_v0, 16  ;;  %v283_v5 = vshll.u32 %v1166_v1, 16  ;;  %v1022_v6 = vunpack.c.l.b16 %v1166_v1  ;;  %v247_v7 = vld [vmem:[%s1160_s22 + $0x4] sm:$0xe] }
  0x12   : > { %v383_v8 = vunpack.c.l.b16 %v247_v7  ;;  %v1019_v9 = vunpack.c.h.b16 %v1163_v0  ;;  %v341_v10 = vshll.u32 %v1169_v2, 16  ;;  %v1182_v12 = vld [vmem:[%s1160_s22 + $0x14] sm:$0xff]   ;;  %v387_v15 = vrot.slane %v1169_v2, 1  ;;  %v243_v29 = vld [vmem:[%s1160_s22 + $0x20] sm:$0xf] }
  0x13   : > { %v280_v13 = vrot.slane %v278_v4, 1  ;;  %v285_v14 = vrot.slane %v283_v5, 1  ;;  %v345_v19 = vshrl.u32 %v1169_v2, 16  ;;  %v287_v21 = vshrl.u32 %v1166_v1, 16  ;;  %v1190_v24 = vld [vmem:[%s1160_s22 + $0x18] sm:$0xff]  }
  0x14   : > { %v384_v16 = vpack.c.b16 %v1022_v6, %v383_v8  ;;  %v328_v17 = vpack.c.b16 %v1022_v6, %v1019_v9  ;;  %v343_v18 = vrot.slane %v341_v10, 1  ;;  %v291_v22 = vshll.u32 %v1179_v11, 16  ;;  %v244_v37 = vld [vmem:[%s1160_s22 + $0x24] sm:$0x1]  ;;  %v1003_v56 = vld [vmem:[%s1160_s22 + $0x24] sm:$0x10] }
  0x15   : > { %v281_v20 = vor.u32 %v280_v13, %v276_v3  ;;  %v349_v23 = vshll.u32 %v1182_v12, 16  ;;  %v1031_v34 = vunpack.c.h.b16 %v1190_v24  ;;  %v1199_v36 = vunpack.c.l.b16 %v243_v29  ;;  %v913_v55 = vld [vmem:[%s1160_s22 + $0x24] sm:$0xf]  ;;  %v1010_v29 = vld [vmem:[%s1385_s1 + $0x30] sm:$0xff] }
  0x16   : > { %v386_v25 = vrot.slane %v384_v16, 1  ;;  %v334_v26 = vshrl.u32 %v328_v17, 16  ;;  %v336_v27 = vshll.u32 %v328_v17, 16  ;;  %v347_v28 = vor.u32 %v345_v19, %v343_v18 }
  0x17   : > { %v286_v30 = vsel %vm274_vm0, %v281_v20, %v285_v14  ;;  %v351_v31 = vrot.slane %v349_v23, 1  ;;  %v289_v39 = vor.u32 %v287_v21, %v285_v14  ;;  %v293_v40 = vrot.slane %v291_v22, 1  ;;  %v1005_v22 = vld [vmem:[%s1385_s1 + $0x8] sm:$0xff]  ;;  %v1008_v23 = vld [vmem:[%s1385_s1 + $0x20] sm:$0xff] }
  0x18   : > { %314 = vrot.lane.b32.xlu0 %v286_v30, %s1107_s23  ;;  %v388_v32 = vsel %vm385_vm1, %v386_v25, %v387_v15  ;;  %v338_v33 = vrot.slane %v336_v27, 1  ;;  %v331_v44 = vpack.c.b16 %v1199_v36, %v1031_v34  ;;  %v389_v45 = vrot.slane %v1182_v12, 1  ;;  %v1011_v25 = vld [vmem:[%s1385_s1 + $0x38] sm:$0xff]  ;;  %480 = vmatpush.bf16.msra.mxu0 %v1005_v22  ;;  %v1004_v27 = vld [vmem:[%s1385_s1] sm:$0xff]  ;;  %v1013_v30 = vld [vmem:[%s1385_s1 + $0x48] sm:$0xff] }
  0x19   : > { %395 = vrot.lane.b32.xlu1 %v388_v32, %s1108_s24  ;;  %v352_v35 = vsel %vm274_vm0, %v347_v28, %v351_v31  ;;  %v295_v48 = vshrl.u32 %v1179_v11, 16  ;;  %v299_v49 = vshll.u32 %v1190_v24, 16  ;;  %v272_v50 = vunpack.c.l.b16 %v244_v37  ;;  %538 = vmatpush.bf16.msra.mxu1 %v1008_v23  ;;  %v1007_v28 = vld [vmem:[%s1385_s1 + $0x18] sm:$0xff] }
  0x1a   : > { %v339_v38 = vor.u32 %v338_v33, %v334_v26  ;;  %374 = vrot.lane.b32.xlu2 %v352_v35, %s1109_s25  ;;  %v294_v51 = vsel %vm274_vm0, %v289_v39, %v293_v40  ;;  %v353_v52 = vshrl.u32 %v1182_v12, 16  ;;  %v357_v53 = vshll.u32 %v331_v44, 16  ;;  %v1014_v26 = vld [vmem:[%s1385_s1 + $0x50] sm:$0xff]  ;;  %605 = vmatpush.bf16.msra.mxu2 %v1011_v25 }
  0x1b   : > { %v390_v54 = vsel %vm385_vm1, %v387_v15, %v389_v45  ;;  %v297_v57 = vor.u32 %v295_v48, %v293_v40  ;;  %v301_v58 = vrot.slane %v299_v49, 1  ;;  %v273_v59 = vpack.c.b16 %v272_v50, %v1199_v36  ;;  %672 = vmatpush.bf16.msra.mxu3 %v1014_v26 }
  0x1c   : > { %v344_v47 = vsel %vm274_vm0, %v339_v38, %v343_v18  ;;  %v355_v60 = vor.u32 %v353_v52, %v351_v31  ;;  %v359_v61 = vrot.slane %v357_v53, 1  ;;  %v914_v62 = vor.u32 %v1003_v56, %v913_v55  ;;  %481 = vmatpush.bf16.msra.mxu0 %v1004_v27  ;;  %v730_v31 = vld [vmem:[%s1387_s3] sm:$0xff]  ;;  %v733_v52 = vld [vmem:[%s1387_s3 + $0x18] sm:$0xff] }
  0x1d   : > { %v391_v63 = vrot.slane %v331_v44, 1  ;;  %v302_v2 = vsel %vm274_vm0, %v297_v57, %v301_v58  ;;  %v303_v3 = vshrl.u32 %v1190_v24, 16  ;;  %v307_v4 = vshll.u32 %v273_v59, 16  ;;  %539 = vmatpush.bf16.msra.mxu1 %v1007_v28 }
  0x1e   : > { %v360_v5 = vsel %vm274_vm0, %v355_v60, %v359_v61  ;;  %v361_v6 = vshrl.u32 %v331_v44, 16  ;;  %v365_v7 = vshll.u32 %v914_v62, 16  ;;  %v393_v14 = vrot.slane %v914_v62, 1  ;;  %606 = vmatpush.bf16.msra.mxu2 %v1010_v29 }
  0x1f   : > { %v392_v8 = vsel %vm385_vm1, %v389_v45, %v391_v63  ;;  %v305_v9 = vor.u32 %v303_v3, %v301_v58  ;;  %v309_v10 = vrot.slane %v307_v4, 1  ;;  %v311_v18 = vshrl.u32 %v273_v59, 16  ;;  %673 = vmatpush.bf16.msra.mxu3 %v1013_v30  ;;  %v734_v3 = vld [vmem:[%s1387_s3 + $0x20] sm:$0xff] }
  0x20   : > { %372 = vrot.lane.b32.xlu0 %v344_v47, %s1109_s25  ;;  %v363_v12 = vor.u32 %v361_v6, %v359_v61  ;;  %v367_v13 = vrot.slane %v365_v7, 1  ;;  %v394_v17 = vsel %vm385_vm1, %v391_v63, %v393_v14  ;;  %v369_v19 = vshrl.u32 %v914_v62, 16  ;;  %v736_v62 = vld [vmem:[%s1387_s3 + $0x30] sm:$0xff]  ;;  %v737_v6 = vld [vmem:[%s1387_s3 + $0x38] sm:$0xff] }
  0x21   : > { %316 = vrot.lane.b32.xlu1 %v294_v51, %s1107_s23  ;;  %v310_v15 = vsel %vm274_vm0, %v305_v9, %v309_v10  ;;  %v313_v20 = vor.u32 %v311_v18, %v309_v10  ;;  %v1110_v32 = vmov 0  }
  0x22   : > { %397 = vrot.lane.b32.xlu2 %v390_v54, %s1108_s24  ;;  %v368_v16 = vsel %vm274_vm0, %v363_v12, %v367_v13  ;;  %v371_v21 = vor.u32 %v369_v19, %v367_v13  ;;  %1079 = vset.pattern.permute.xlu0 %v1110_v32  ;;  %v1340_v13 = vld [vmem:[%s1386_s2] ss:$0 sm:$0xff] }
  0x23   : > { %1080 = vset.pattern.permute.xlu1 %v1110_v32  ;;  %1081 = vset.pattern.permute.xlu2 %v1110_v32 }
  0x28   : > { %318 = vrot.lane.b32.xlu0 %v302_v2, %s1107_s23  ;;  %v738_v2 = vld [vmem:[%s1387_s3 + $0x40] sm:$0xff] }
  0x29   : > { %376 = vrot.lane.b32.xlu1 %v360_v5, %s1109_s25 }
  0x2a   : > { %399 = vrot.lane.b32.xlu2 %v392_v8, %s1108_s24 }
  0x30   : > { %320 = vrot.lane.b32.xlu0 %v310_v15, %s1107_s23 }
  0x31   : > { %378 = vrot.lane.b32.xlu1 %v368_v16, %s1109_s25 }
  0x32   : > { %401 = vrot.lane.b32.xlu2 %v394_v17, %s1108_s24 }
  0x38   : > { %322 = vrot.lane.b32.xlu0 %v313_v20, %s1107_s23 }
  0x39   : > { %380 = vrot.lane.b32.xlu1 %v371_v21, %s1109_s25 }
  0x3a   : > { %403 = vrot.lane.b32.xlu2 %v393_v14, %s1108_s24 }
  0x40   : > { %741 = vperm.xlu0 %1079, %v730_v31  }
  0x74   : > { %v375_v33 = vpop.permute.xlu2 %374 }
  0x7c   : > { %v398_v39 = vpop.permute.xlu2 %397 }
  0x84   : > { %v400_v44 = vpop.permute.xlu2 %399 }
  0x8a   : > { %v315_v34 = vpop.permute.xlu0 %314 }
  0x8b   : > { %v396_v35 = vpop.permute.xlu1 %395  ;;  %v407_v37 = vsel %vm405_vm2, %v1163_v0, %v315_v34  ;;  %v731_v0 = vld [vmem:[%s1387_s3 + $0x8] sm:$0xff] }
  0x8c   : > { %746 = vperm.xlu1 %1080, %v731_v0   ;;  %v402_v49 = vpop.permute.xlu2 %401 }
  0x92   : > { %v373_v38 = vpop.permute.xlu0 %372 }
  0x93   : > { %v419_v40 = vsel %vm417_vm3, %v407_v37, %v373_v38  ;;  %v317_v41 = vpop.permute.xlu1 %316 }
  0x94   : > { %v430_v42 = vsel %vm428_vm4, %v419_v40, %v396_v35  ;;  %v409_v46 = vsel %vm405_vm2, %v1166_v1, %v317_v41  ;;  %756 = vperm.xlu1 %1080, %v733_v52   ;;  %v270_v1 = vpack.c.b16 %v1199_v36, %v1199_v36  ;;  %v404_v54 = vpop.permute.xlu2 %403  ;;  %v735_v36 = vld [vmem:[%s1387_s3 + $0x28] sm:$0xff] }
  0x95   : > { %927 = vmatmul.msk.bf16.vlgmr.msra.gmra.mxu0 %vm463_vm5, %v430_v42  ;;  %950 = vmatmul.msk.bf16.vlgmr.msra.gmra.mxu1 %vm463_vm5, %v430_v42  ;;  %v421_v47 = vsel %vm417_vm3, %v409_v46, %v375_v33 }
  0x96   : > { %973 = vmatmul.msk.bf16.vlgmr.msra.gmra.mxu2 %vm463_vm5, %v430_v42  ;;  %996 = vmatmul.msk.bf16.vlgmr.msra.gmra.mxu3 %vm463_vm5, %v430_v42  ;;  %v432_v51 = vsel %vm428_vm4, %v421_v47, %v398_v39 }
  0x97   : > { %766 = vperm.xlu0 %1079, %v735_v36  }
  0x9a   : > { %v319_v43 = vpop.permute.xlu0 %318 }
  0x9b   : > { %v377_v45 = vpop.permute.xlu1 %376  ;;  %v411_v57 = vsel %vm405_vm2, %v1179_v11, %v319_v43  ;;  %v732_v11 = vld [vmem:[%s1387_s3 + $0x10] sm:$0xff] }
  0x9c   : > { %v423_v60 = vsel %vm417_vm3, %v411_v57, %v377_v45  ;;  %751 = vperm.xlu2 %1081, %v732_v11   ;;  %771 = vperm.xlu1 %1080, %v736_v62  }
  0x9d   : > { %v434_v61 = vsel %vm428_vm4, %v423_v60, %v400_v44 }
  0x9f   : > { %781 = vperm.xlu0 %1079, %v738_v2  }
  0xa2   : > { %v321_v48 = vpop.permute.xlu0 %320 }
  0xa3   : > { %v379_v50 = vpop.permute.xlu1 %378  ;;  %v413_v63 = vsel %vm405_vm2, %v1190_v24, %v321_v48 }
  0xa4   : > { %v425_v4 = vsel %vm417_vm3, %v413_v63, %v379_v50  ;;  %761 = vperm.xlu2 %1081, %v734_v3  }
  0xa5   : > { %928 = vmatmul.msk.bf16.gmra.mxu0 %vm463_vm5, %v432_v51  ;;  %951 = vmatmul.msk.bf16.gmra.mxu1 %vm463_vm5, %v432_v51  ;;  %v436_v5 = vsel %vm428_vm4, %v425_v4, %v402_v49 }
  0xa6   : > { %974 = vmatmul.msk.bf16.gmra.mxu2 %vm463_vm5, %v432_v51  ;;  %997 = vmatmul.msk.bf16.gmra.mxu3 %vm463_vm5, %v432_v51 }
  0xaa   : > { %v323_v53 = vpop.permute.xlu0 %322 }
  0xab   : > { %v416_v55 = vsel %vm405_vm2, %v270_v1, %v323_v53  ;;  %v381_v56 = vpop.permute.xlu1 %380 }
  0xac   : > { %v427_v58 = vsel %vm417_vm3, %v416_v55, %v381_v56  ;;  %776 = vperm.xlu2 %1081, %v737_v6  }
  0xad   : > { %v438_v59 = vsel %vm428_vm4, %v427_v58, %v404_v54 }
  0xb2   : > { %v742_v18 = vpop.permute.xlu0 %741 }
  0xb5   : > { %929 = vmatmul.msk.bf16.gmra.mxu0 %vm463_vm5, %v434_v61  ;;  %952 = vmatmul.msk.bf16.gmra.mxu1 %vm463_vm5, %v434_v61 }
  0xb6   : > { %975 = vmatmul.msk.bf16.gmra.mxu2 %vm463_vm5, %v434_v61  ;;  %998 = vmatmul.msk.bf16.gmra.mxu3 %vm463_vm5, %v434_v61 }
  0xc5   : > { %930 = vmatmul.msk.bf16.gmra.mxu0 %vm463_vm5, %v436_v5  ;;  %953 = vmatmul.msk.bf16.gmra.mxu1 %vm463_vm5, %v436_v5 }
  0xc6   : > { %976 = vmatmul.msk.bf16.gmra.mxu2 %vm463_vm5, %v436_v5  ;;  %999 = vmatmul.msk.bf16.gmra.mxu3 %vm463_vm5, %v436_v5 }
  0xd5   : > { %931 = vmatmul.msk.bf16.gmra.mxu0 %vm463_vm5, %v438_v59  ;;  %954 = vmatmul.msk.bf16.gmra.mxu1 %vm463_vm5, %v438_v59 }
  0xd6   : > { %977 = vmatmul.msk.bf16.gmra.mxu2 %vm463_vm5, %v438_v59  ;;  %1000 = vmatmul.msk.bf16.gmra.mxu3 %vm463_vm5, %v438_v59 }
  0xf6   : > { %v752_v43 = vpop.permute.xlu2 %751 }
  0xfe   : > { %v747_v31 = vpop.permute.xlu1 %746  ;;  %v762_v2 = vpop.permute.xlu2 %761 }
 0x106   : > { %v757_v54 = vpop.permute.xlu1 %756 }
 0x112   : > { %v483_v24 = vpop.f32.mrf.mxu0  ;;  %v541_v7 = vpop.f32.mrf.mxu1 }
 0x113   : > { %v565_v8 = vmax.f32 %v483_v24, %v541_v7 }
 0x119   : > { %v608_v9 = vpop.f32.mrf.mxu2  ;;  %v675_v10 = vpop.f32.mrf.mxu3 }
 0x11a   : > { %v632_v12 = vmax.f32 %v565_v8, %v608_v9  ;;  %v485_v14 = vpop.f32.mrf.mxu0  ;;  %v543_v15 = vpop.f32.mrf.mxu1 }
 0x11b   : > { %v566_v19 = vmax.f32 %v485_v14, %v543_v15  ;;  %v767_v15 = vpop.permute.xlu0 %766 }
 0x11c   : > { %v699_v16 = vmax.f32 %v632_v12, %v675_v10 }
 0x11e   : > { %v712_v17 = vadd.f32 %v1340_v13, %v699_v16 }
 0x120   : > { %v721_v20 = vmax.f32 %v712_v17, 0.0 }
 0x121   : > { %v610_v21 = vpop.f32.mrf.mxu2  ;;  %v677_v22 = vpop.f32.mrf.mxu3 }
 0x122   : > { %v633_v23 = vmax.f32 %v566_v19, %v610_v21  ;;  %v784_v25 = vmul.f32 %v742_v18, %v721_v20  ;;  %v488_v26 = vpop.f32.mrf.mxu0  ;;  %v546_v27 = vpop.f32.mrf.mxu1 }
 0x123   : > { %v567_v32 = vmax.f32 %v488_v26, %v546_v27 }
 0x124   : > { %v700_v28 = vmax.f32 %v633_v23, %v677_v22  ;;  %v793_v29 = vpack.c.bf16 %v784_v25, %v784_v25 }
 0x126   : > { %v713_v30 = vadd.f32 %v1340_v13, %v700_v28  ;;  %803 = vst.msk [vmem:[%s1347_s29] sm:$0xf] %vm802_vm6, %v793_v29  ;;  %v772_v28 = vpop.permute.xlu1 %771 }
 0x128   : > { %v722_v33 = vmax.f32 %v713_v30, 0.0 }
 0x129   : > { %v613_v34 = vpop.f32.mrf.mxu2  ;;  %v680_v35 = vpop.f32.mrf.mxu3 }
 0x12a   : > { %v785_v37 = vmul.f32 %v747_v31, %v722_v33  ;;  %v634_v38 = vmax.f32 %v567_v32, %v613_v34  ;;  %v490_v39 = vpop.f32.mrf.mxu0  ;;  %v548_v40 = vpop.f32.mrf.mxu1 }
 0x12b   : > { %v568_v44 = vmax.f32 %v490_v39, %v548_v40 }
 0x12c   : > { %v794_v41 = vpack.c.bf16 %v785_v37, %v785_v37  ;;  %v701_v42 = vmax.f32 %v634_v38, %v680_v35 }
 0x12e   : > { %804 = vst.msk [vmem:[%s1347_s29 + $0x4] sm:$0xf] %vm802_vm6, %v794_v41  ;;  %v714_v0 = vadd.f32 %v1340_v13, %v701_v42  ;;  %v777_v41 = vpop.permute.xlu2 %776 }
 0x130   : > { %v723_v45 = vmax.f32 %v714_v0, 0.0 }
 0x131   : > { %v615_v46 = vpop.f32.mrf.mxu2  ;;  %v682_v47 = vpop.f32.mrf.mxu3 }
 0x132   : > { %v786_v48 = vmul.f32 %v752_v43, %v723_v45  ;;  %v635_v49 = vmax.f32 %v568_v44, %v615_v46  ;;  %v493_v50 = vpop.f32.mrf.mxu0  ;;  %v551_v51 = vpop.f32.mrf.mxu1 }
 0x133   : > { %v569_v55 = vmax.f32 %v493_v50, %v551_v51 }
 0x134   : > { %v795_v52 = vpack.c.bf16 %v786_v48, %v786_v48  ;;  %v702_v1 = vmax.f32 %v635_v49, %v682_v47 }
 0x136   : > { %805 = vst.msk [vmem:[%s1347_s29 + $0x8] sm:$0xf] %vm802_vm6, %v795_v52  ;;  %v715_v53 = vadd.f32 %v1340_v13, %v702_v1  ;;  %v782_v52 = vpop.permute.xlu0 %781 }
 0x138   : > { %v724_v56 = vmax.f32 %v715_v53, 0.0 }
 0x139   : > { %v618_v57 = vpop.f32.mrf.mxu2  ;;  %v685_v58 = vpop.f32.mrf.mxu3 }
 0x13a   : > { %v787_v59 = vmul.f32 %v757_v54, %v724_v56  ;;  %v636_v60 = vmax.f32 %v569_v55, %v618_v57  ;;  %v495_v61 = vpop.f32.mrf.mxu0  ;;  %v553_v11 = vpop.f32.mrf.mxu1 }
 0x13b   : > { %v570_v3 = vmax.f32 %v495_v61, %v553_v11 }
 0x13c   : > { %v796_v36 = vpack.c.bf16 %v787_v59, %v787_v59  ;;  %v703_v62 = vmax.f32 %v636_v60, %v685_v58 }
 0x13e   : > { %806 = vst.msk [vmem:[%s1347_s29 + $0xc] sm:$0xf] %vm802_vm6, %v796_v36  ;;  %v716_v63 = vadd.f32 %v1340_v13, %v703_v62 }
 0x140   : > { %v725_v4 = vmax.f32 %v716_v63, 0.0 }
 0x141   : > { %v620_v5 = vpop.f32.mrf.mxu2  ;;  %v687_v6 = vpop.f32.mrf.mxu3 }
 0x142   : > { %v788_v24 = vmul.f32 %v762_v2, %v725_v4  ;;  %v637_v7 = vmax.f32 %v570_v3, %v620_v5  ;;  %v498_v8 = vpop.f32.mrf.mxu0  ;;  %v556_v9 = vpop.f32.mrf.mxu1 }
 0x143   : > { %v571_v16 = vmax.f32 %v498_v8, %v556_v9 }
 0x144   : > { %v797_v10 = vpack.c.bf16 %v788_v24, %v788_v24  ;;  %v704_v12 = vmax.f32 %v637_v7, %v687_v6 }
 0x146   : > { %807 = vst.msk [vmem:[%s1347_s29 + $0x10] sm:$0xf] %vm802_vm6, %v797_v10  ;;  %v717_v14 = vadd.f32 %v1340_v13, %v704_v12 }
 0x148   : > { %v726_v17 = vmax.f32 %v717_v14, 0.0 }
 0x149   : > { %v623_v18 = vpop.f32.mrf.mxu2  ;;  %v690_v19 = vpop.f32.mrf.mxu3 }
 0x14a   : > { %v638_v20 = vmax.f32 %v571_v16, %v623_v18  ;;  %v789_v21 = vmul.f32 %v767_v15, %v726_v17  ;;  %v500_v22 = vpop.f32.mrf.mxu0  ;;  %v558_v23 = vpop.f32.mrf.mxu1 }
 0x14b   : > { %v572_v29 = vmax.f32 %v500_v22, %v558_v23 }
 0x14c   : > { %v705_v25 = vmax.f32 %v638_v20, %v690_v19  ;;  %v798_v26 = vpack.c.bf16 %v789_v21, %v789_v21 }
 0x14e   : > { %v718_v27 = vadd.f32 %v1340_v13, %v705_v25  ;;  %808 = vst.msk [vmem:[%s1347_s29 + $0x14] sm:$0xf] %vm802_vm6, %v798_v26 }
 0x150   : > { %v727_v30 = vmax.f32 %v718_v27, 0.0 }
 0x151   : > { %v625_v31 = vpop.f32.mrf.mxu2  ;;  %v692_v32 = vpop.f32.mrf.mxu3 }
 0x152   : > { %v790_v33 = vmul.f32 %v772_v28, %v727_v30  ;;  %v639_v34 = vmax.f32 %v572_v29, %v625_v31  ;;  %v503_v35 = vpop.f32.mrf.mxu0  ;;  %v561_v37 = vpop.f32.mrf.mxu1 }
 0x153   : > { %v573_v0 = vmax.f32 %v503_v35, %v561_v37 }
 0x154   : > { %v799_v38 = vpack.c.bf16 %v790_v33, %v790_v33  ;;  %v706_v39 = vmax.f32 %v639_v34, %v692_v32 }
 0x156   : > { %809 = vst.msk [vmem:[%s1347_s29 + $0x18] sm:$0xf] %vm802_vm6, %v799_v38  ;;  %v719_v40 = vadd.f32 %v1340_v13, %v706_v39 }
 0x158   : > { %v728_v42 = vmax.f32 %v719_v40, 0.0 }
 0x159   : > { %v628_v43 = vpop.f32.mrf.mxu2  ;;  %v695_v44 = vpop.f32.mrf.mxu3 }
 0x15a   : > { %v791_v45 = vmul.f32 %v777_v41, %v728_v42  ;;  %v640_v46 = vmax.f32 %v573_v0, %v628_v43  ;;  %v505_v47 = vpop.f32.mrf.mxu0  ;;  %v563_v48 = vpop.f32.mrf.mxu1 }
 0x15c   : > { %v800_v49 = vpack.c.bf16 %v791_v45, %v791_v45  ;;  %v707_v50 = vmax.f32 %v640_v46, %v695_v44 }
 0x15e   : > { %810 = vst.msk [vmem:[%s1347_s29 + $0x1c] sm:$0xf] %vm802_vm6, %v800_v49  ;;  %v720_v51 = vadd.f32 %v1340_v13, %v707_v50 }
 0x160   : > { %v729_v1 = vmax.f32 %v720_v51, 0.0 }
 0x161   : > { %v630_v53 = vpop.f32.mrf.mxu2  ;;  %v697_v54 = vpop.f32.mrf.mxu3 }
 0x162   : > { %v792_v55 = vmul.f32 %v782_v52, %v729_v1 }
 0x164   : > { %v801_v56 = vpack.c.bf16 %v792_v55, %v792_v55 }
 0x166   : > { %811 = vst.msk [vmem:[%s1347_s29 + $0x20] sm:$0xf] %vm802_vm6, %v801_v56 }
 0x167 PF: > { %s14_s17 = sadd.s32 1, %s1105_s17   ;;  %s1389_s15 = smov %s1101_s16 }
 0x168   : > { %p11_p5 = scmp.ge.s32.totalorder %s14_s17, 4   ;;  %s1390_s16 = smov %s1392_s18 }
 0x16a   :  { %13 = sbr.rel (!%p11_p5) target bundleno = 2 (0x2), region = 69 }

// kernel: cnn_forward.4
= control target key start
LH: loop header
LB: loop body
LE: loop exit
PB: predicated region body
PF: predicated region fallthrough
CT: control target
= control target key end

     0   :  { %s2696_s15 = smov 0   ;;  %s2698_s16 = smov 0   ;;  %s3213_s0 = inlined_call_operand.vmem [shape: bf16[2,1,30,128], index: 0, kind: input, shape index: {}]   ;;  %s3214_s1 = inlined_call_operand.vmem [shape: bf16[4,512,64], index: 1, kind: input, shape index: {}]   ;;  %s3215_s2 = inlined_call_operand.vmem [shape: f32[1,64], index: 2, kind: input, shape index: {}]   ;;  %s3216_s3 = inlined_call_operand.vmem [shape: f32[20,1], index: 3, kind: input, shape index: {}]   ;;  %s3217_s4 = inlined_call_operand.vmem [shape: bf16[2,1,20,64], index: 4, kind: output, shape index: {}]  }
   0x1   :  { %s2700_s17 = smov 0  }
   0x2 LB: > { %s26_s18 = sadd.s32 1, %s2664_s16  ;;  %p1769_p0 = scmp.ge.s32.totalorder %s2668_s17, 1  ;;  %s2668_s17 = sphi %s2700_s17, %s14_s17   ;;  %s2664_s16 = sphi %s2698_s16, %s3219_s16   ;;  %s2660_s15 = sphi %s2696_s15, %s3218_s15  }
   0x3   : > { %p28_p1 = scmp.ge.s32.totalorder %s26_s18, 2  ;;  %p182_p2 = scmp.lt.s32.totalorder %s2668_s17, 3 }
   0x5   : > { %s3221_s18 = smov (%p28_p1, %s26_s18), 0  ;;  %p183_p3 = pnand %p1769_p0, %p182_p2 }
   0x6   : > { %p216_p4 = scmp.lt.s32.totalorder (!%p183_p3), %s2660_s15, 1 }
   0x7   : > { %186 = sbr.rel (%p183_p3) target bundleno = 305 (0x131), region = 36 }
   0xc   : > { %v2492_v0 = vld [vmem:[%s3214_s1 + $0x38] sm:$0xff]  ;;  %v2491_v4 = vld [vmem:[%s3214_s1 + $0x30] sm:$0xff]  ;;  %s3223_s15 = smov (!%p216_p4, %s2660_s15), 1  ;;  %v2490_v8 = vld [vmem:[%s3214_s1 + $0x28] sm:$0xff]  ;;  %vm255_vm0 = vsmask.f32 7424 }
   0xd   : > { %v2500_v1 = vld [vmem:[%s3214_s1 + $0x78] sm:$0xff]  ;;  %566 = vmatpush.bf16.msra.mxu0 %v2492_v0  ;;  %v2499_v5 = vld [vmem:[%s3214_s1 + $0x70] sm:$0xff]  ;;  %s2483_s9 = sshll.u32 %s3223_s15, 4  ;;  %v2498_v9 = vld [vmem:[%s3214_s1 + $0x68] sm:$0xff]  ;;  %vm281_vm1 = vsmask.f32 5376 }
   0xe   : > { %v2508_v2 = vld [vmem:[%s3214_s1 + $0xb8] sm:$0xff]  ;;  %584 = vmatpush.bf16.msra.mxu1 %v2500_v1  ;;  %v2507_v6 = vld [vmem:[%s3214_s1 + $0xb0] sm:$0xff]  ;;  %v2506_v10 = vld [vmem:[%s3214_s1 + $0xa8] sm:$0xff]  ;;  %s2756_s24 = scalar_lea.vmem %s3213_s0, %s2483_s9  ;;  %vm304_vm2 = vcmask 1044480   ;;  %s2617_s26 = smul.u32 12, %s3223_s15  ;;  %vm1668_vm3 = vcmask 519168  }
   0xf   : > { %v2516_v3 = vld [vmem:[%s3214_s1 + $0xf8] sm:$0xff]  ;;  %602 = vmatpush.bf16.msra.mxu2 %v2508_v2  ;;  %v2515_v7 = vld [vmem:[%s3214_s1 + $0xf0] sm:$0xff]  ;;  %v2514_v11 = vld [vmem:[%s3214_s1 + $0xe8] sm:$0xff]  ;;  %vm1671_vm4 = vcmask 517120  }
  0x10   : > { %620 = vmatpush.bf16.msra.mxu3 %v2516_v3  ;;  %v2489_v12 = vld [vmem:[%s3214_s1 + $0x20] sm:$0xff]  ;;  %v237_v17 = vld [vmem:[%s2756_s24 + $0x8] sm:$0x7]  ;;  %v2484_v21 = vld [vmem:[%s2756_s24 + $0x8] sm:$0x10]  ;;  %s233_s29 = scalar_lea.vmem %s3217_s4, %s2617_s26 }
  0x11   : > { %567 = vmatpush.bf16.msra.mxu0 %v2491_v4  ;;  %v2497_v13 = vld [vmem:[%s3214_s1 + $0x60] sm:$0xff]  ;;  %v1775_v20 = vld [vmem:[%s2756_s24 + $0x8] sm:$0xf]  ;;  %v2488_v23 = vld [vmem:[%s3214_s1 + $0x18] sm:$0xff]  ;;  %v253_v25 = vunpack.c.l.b16 %v237_v17 }
  0x12   : > { %585 = vmatpush.bf16.msra.mxu1 %v2499_v5  ;;  %v2505_v14 = vld [vmem:[%s3214_s1 + $0xa0] sm:$0xff]  ;;  %v2496_v24 = vld [vmem:[%s3214_s1 + $0x58] sm:$0xff]  ;;  %v1776_v29 = vor.u32 %v2484_v21, %v1775_v20  ;;  %v2487_v31 = vld [vmem:[%s3214_s1 + $0x10] sm:$0xff] }
  0x13   : > { %603 = vmatpush.bf16.msra.mxu2 %v2507_v6  ;;  %v2768_v15 = vld [vmem:[%s2756_s24] sm:$0xff]   ;;  %v2504_v26 = vld [vmem:[%s3214_s1 + $0x98] sm:$0xff]  ;;  %v2495_v32 = vld [vmem:[%s3214_s1 + $0x50] sm:$0xff]  ;;  %v2797_v33 = vpack.c.b16 %v253_v25, %v253_v25 }
  0x14   : > { %621 = vmatpush.bf16.msra.mxu3 %v2515_v7  ;;  %v2513_v16 = vld [vmem:[%s3214_s1 + $0xe0] sm:$0xff]  ;;  %v2616_v18 = vunpack.c.h.b16 %v2768_v15  ;;  %v2512_v27 = vld [vmem:[%s3214_s1 + $0xd8] sm:$0xff]  ;;  %v259_v34 = vshll.u32 %v2768_v15, 16  ;;  %v2503_v36 = vld [vmem:[%s3214_s1 + $0x90] sm:$0xff]  ;;  %v291_v40 = vshrl.u32 %v1776_v29, 16  ;;  %v294_v41 = vshll.u32 %v1776_v29, 16 }
  0x15   : > { %568 = vmatpush.bf16.msra.mxu0 %v2490_v8  ;;  %v238_v19 = vld [vmem:[%s2756_s24] sm:$0xc]  ;;  %v2511_v37 = vld [vmem:[%s3214_s1 + $0xd0] sm:$0xff]  ;;  %v2486_v42 = vld [vmem:[%s3214_s1 + $0x8] sm:$0xff]  ;;  %v257_v44 = vshrl.u32 %v2768_v15, 16  ;;  %v264_v46 = vshll.u32 %v2797_v33, 16 }
  0x16   : > { %586 = vmatpush.bf16.msra.mxu1 %v2498_v9  ;;  %v276_v22 = vunpack.c.l.b16 %v238_v19  ;;  %v241_v30 = vld [vmem:[%s2756_s24] sm:$0x8]  ;;  %v2494_v43 = vld [vmem:[%s3214_s1 + $0x48] sm:$0xff]  ;;  %v261_v45 = vrot.slane %v259_v34, 1  ;;  %v293_v52 = vrot.slane %v291_v40, 2  ;;  %v296_v53 = vrot.slane %v294_v41, 3 }
  0x17   : > { %604 = vmatpush.bf16.msra.mxu2 %v2506_v10  ;;  %v302_v35 = vunpack.c.l.b16 %v241_v30  ;;  %v2502_v48 = vld [vmem:[%s3214_s1 + $0x88] sm:$0xff]  ;;  %v2485_v54 = vld [vmem:[%s3214_s1] sm:$0xff]  ;;  %v266_v57 = vrot.slane %v264_v46, 1  ;;  %v2834_v63 = vrot.slane %v1776_v29, 3  ;;  %v2540_v0 = vld [vmem:[%s3214_s1 + $0x1b8] sm:$0xff]  ;;  %v268_v20 = vshrl.u32 %v2797_v33, 16 }
  0x18   : > { %622 = vmatpush.bf16.msra.mxu3 %v2514_v11  ;;  %v279_v28 = vpack.c.b16 %v2616_v18, %v276_v22  ;;  %v2510_v49 = vld [vmem:[%s3214_s1 + $0xc8] sm:$0xff]  ;;  %v2493_v55 = vld [vmem:[%s3214_s1 + $0x40] sm:$0xff]  ;;  %v262_v56 = vor.u32 %v261_v45, %v257_v44  ;;  %v2832_v61 = vor.u32 %v296_v53, %v293_v52  ;;  %v2524_v1 = vld [vmem:[%s3214_s1 + $0x138] sm:$0xff] }
  0x19   : > { %569 = vmatpush.bf16.msra.mxu0 %v2489_v12  ;;  %v303_v47 = vpack.c.b16 %v2616_v18, %v302_v35  ;;  %v2501_v58 = vld [vmem:[%s3214_s1 + $0x80] sm:$0xff]  ;;  %v2532_v5 = vld [vmem:[%s3214_s1 + $0x178] sm:$0xff]  ;;  %v2539_v7 = vld [vmem:[%s3214_s1 + $0x1b0] sm:$0xff] }
  0x1a   : > { %587 = vmatpush.bf16.msra.mxu1 %v2497_v13  ;;  %v283_v38 = vshrl.u32 %v279_v28, 16  ;;  %v286_v39 = vshll.u32 %v279_v28, 16  ;;  %v2509_v59 = vld [vmem:[%s3214_s1 + $0xc0] sm:$0xff]  ;;  %v2843_v2 = vsel %vm255_vm0, %v262_v56, %v266_v57  ;;  %v2548_v6 = vld [vmem:[%s3214_s1 + $0x1f8] sm:$0xff]  ;;  %v2523_v8 = vld [vmem:[%s3214_s1 + $0x130] sm:$0xff] }
  0x1b   : > { %605 = vmatpush.bf16.msra.mxu2 %v2505_v14  ;;  %v305_v62 = vrot.slane %v303_v47, 3  ;;  %v2531_v9 = vld [vmem:[%s3214_s1 + $0x170] sm:$0xff]  ;;  %v2538_v11 = vld [vmem:[%s3214_s1 + $0x1a8] sm:$0xff]  ;;  %v2537_v17 = vld [vmem:[%s3214_s1 + $0x1a0] sm:$0xff] }
  0x1c   : > { %623 = vmatpush.bf16.msra.mxu3 %v2513_v16  ;;  %v285_v50 = vrot.slane %v283_v38, 2  ;;  %v288_v51 = vrot.slane %v286_v39, 3  ;;  %v2547_v10 = vld [vmem:[%s3214_s1 + $0x1f0] sm:$0xff]  ;;  %v2522_v12 = vld [vmem:[%s3214_s1 + $0x128] sm:$0xff]  ;;  %v2521_v18 = vld [vmem:[%s3214_s1 + $0x120] sm:$0xff] }
  0x1d   : > { %570 = vmatpush.bf16.msra.mxu0 %v2488_v23  ;;  %v2849_v4 = vsel %vm304_vm2, %v305_v62, %v2834_v63  ;;  %v236_v13 = vld [vmem:[%s2756_s24 + $0x8] sm:$0x3]  ;;  %v2529_v21 = vld [vmem:[%s3214_s1 + $0x160] sm:$0xff]  ;;  %v2536_v23 = vld [vmem:[%s3214_s1 + $0x198] sm:$0xff] }
  0x1e   : > { %588 = vmatpush.bf16.msra.mxu1 %v2496_v24  ;;  %v289_v60 = vor.u32 %v288_v51, %v285_v50  ;;  %v2530_v14 = vld [vmem:[%s3214_s1 + $0x168] sm:$0xff]  ;;  %v247_v19 = vunpack.c.l.b16 %v236_v13  ;;  %v2545_v22 = vld [vmem:[%s3214_s1 + $0x1e0] sm:$0xff]  ;;  %v2520_v24 = vld [vmem:[%s3214_s1 + $0x118] sm:$0xff] }
  0x1f   : > { %606 = vmatpush.bf16.msra.mxu2 %v2504_v26  ;;  %v2546_v16 = vld [vmem:[%s3214_s1 + $0x1e8] sm:$0xff]  ;;  %v2907_v26 = vor.u32 %v268_v20, %v266_v57  ;;  %v2544_v28 = vld [vmem:[%s3214_s1 + $0x1d8] sm:$0xff]  ;;  %v2535_v29 = vld [vmem:[%s3214_s1 + $0x190] sm:$0xff] }
  0x20   : > { %624 = vmatpush.bf16.msra.mxu3 %v2512_v27  ;;  %v2846_v3 = vsel %vm281_vm1, %v289_v60, %v2832_v61  ;;  %v2905_v25 = vpack.c.b16 %v247_v19, %v247_v19  ;;  %v2528_v27 = vld [vmem:[%s3214_s1 + $0x158] sm:$0xff]  ;;  %v2519_v30 = vld [vmem:[%s3214_s1 + $0x110] sm:$0xff]  ;;  %v2534_v33 = vld [vmem:[%s3214_s1 + $0x188] sm:$0xff] }
  0x21   : > { %571 = vmatpush.bf16.msra.mxu0 %v2487_v31  ;;  %v2527_v31 = vld [vmem:[%s3214_s1 + $0x150] sm:$0xff]  ;;  %v2518_v34 = vld [vmem:[%s3214_s1 + $0x108] sm:$0xff]  ;;  %v2517_v38 = vld [vmem:[%s3214_s1 + $0x100] sm:$0xff] }
  0x22   : > { %589 = vmatpush.bf16.msra.mxu1 %v2495_v32  ;;  %v2543_v32 = vld [vmem:[%s3214_s1 + $0x1d0] sm:$0xff]  ;;  %v2526_v35 = vld [vmem:[%s3214_s1 + $0x148] sm:$0xff]  ;;  %v2572_v39 = vld [vmem:[%s3214_s1 + $0x2b8] sm:$0xff] }
  0x23   : > { %607 = vmatpush.bf16.msra.mxu2 %v2503_v36  ;;  %v2542_v36 = vld [vmem:[%s3214_s1 + $0x1c8] sm:$0xff]  ;;  %v2556_v40 = vld [vmem:[%s3214_s1 + $0x238] sm:$0xff]  ;;  %v2525_v41 = vld [vmem:[%s3214_s1 + $0x140] sm:$0xff] }
  0x24   : > { %625 = vmatpush.bf16.msra.mxu3 %v2511_v37  ;;  %v2533_v37 = vld [vmem:[%s3214_s1 + $0x180] sm:$0xff]  ;;  %v2580_v44 = vld [vmem:[%s3214_s1 + $0x2f8] sm:$0xff]  ;;  %v2571_v45 = vld [vmem:[%s3214_s1 + $0x2b0] sm:$0xff] }
  0x25   : > { %572 = vmatpush.bf16.msra.mxu0 %v2486_v42  ;;  %v2541_v42 = vld [vmem:[%s3214_s1 + $0x1c0] sm:$0xff]  ;;  %v2555_v46 = vld [vmem:[%s3214_s1 + $0x230] sm:$0xff]  ;;  %v2554_v50 = vld [vmem:[%s3214_s1 + $0x228] sm:$0xff] }
  0x26   : > { %590 = vmatpush.bf16.msra.mxu1 %v2494_v43  ;;  %v2564_v43 = vld [vmem:[%s3214_s1 + $0x278] sm:$0xff]  ;;  %v2563_v47 = vld [vmem:[%s3214_s1 + $0x270] sm:$0xff]  ;;  %v2562_v51 = vld [vmem:[%s3214_s1 + $0x268] sm:$0xff] }
  0x27   : > { %608 = vmatpush.bf16.msra.mxu2 %v2502_v48  ;;  %v2579_v48 = vld [vmem:[%s3214_s1 + $0x2f0] sm:$0xff]  ;;  %v2578_v52 = vld [vmem:[%s3214_s1 + $0x2e8] sm:$0xff]  ;;  %v2569_v53 = vld [vmem:[%s3214_s1 + $0x2a0] sm:$0xff] }
  0x28   : > { %626 = vmatpush.bf16.msra.mxu3 %v2510_v49  ;;  %v2570_v49 = vld [vmem:[%s3214_s1 + $0x2a8] sm:$0xff]  ;;  %v2577_v56 = vld [vmem:[%s3214_s1 + $0x2e0] sm:$0xff]  ;;  %v2568_v57 = vld [vmem:[%s3214_s1 + $0x298] sm:$0xff] }
  0x29   : > { %573 = vmatpush.bf16.msra.mxu0 %v2485_v54  ;;  %v2553_v54 = vld [vmem:[%s3214_s1 + $0x220] sm:$0xff]  ;;  %v2576_v60 = vld [vmem:[%s3214_s1 + $0x2d8] sm:$0xff]  ;;  %v2567_v62 = vld [vmem:[%s3214_s1 + $0x290] sm:$0xff] }
  0x2a   : > { %591 = vmatpush.bf16.msra.mxu1 %v2493_v55  ;;  %v2561_v55 = vld [vmem:[%s3214_s1 + $0x260] sm:$0xff]  ;;  %v2603_v19 = vld [vmem:[%s3214_s1 + $0x3b0] sm:$0xff] }
  0x2b   : > { %609 = vmatpush.bf16.msra.mxu2 %v2501_v58  ;;  %v2552_v58 = vld [vmem:[%s3214_s1 + $0x218] sm:$0xff]  ;;  %v2557_v13 = vld [vmem:[%s3214_s1 + $0x240] sm:$0xff]  ;;  %v2595_v20 = vld [vmem:[%s3214_s1 + $0x370] sm:$0xff] }
  0x2c   : > { %627 = vmatpush.bf16.msra.mxu3 %v2509_v59  ;;  %574 = vmatmul.bf16.vlgmr.msra.gmra.mxu0 %v2768_v15  ;;  %v2560_v59 = vld [vmem:[%s3214_s1 + $0x258] sm:$0xff] }
  0x2d   : > { %895 = vmatpush.bf16.msrb.mxu0 %v2524_v1  ;;  %592 = vmatmul.bf16.vlgmr.msra.gmra.mxu1 %v2843_v2  ;;  %v2559_v1 = vld [vmem:[%s3214_s1 + $0x250] sm:$0xff] }
  0x2e   : > { %610 = vmatmul.bf16.vlgmr.msra.gmra.mxu2 %v2846_v3  ;;  %913 = vmatpush.bf16.msrb.mxu1 %v2532_v5  ;;  %v2575_v5 = vld [vmem:[%s3214_s1 + $0x2d0] sm:$0xff] }
  0x2f   : > { %931 = vmatpush.bf16.msrb.mxu2 %v2540_v0  ;;  %628 = vmatmul.bf16.vlgmr.msra.gmra.mxu3 %v2849_v4  ;;  %v2551_v0 = vld [vmem:[%s3214_s1 + $0x210] sm:$0xff] }
  0x30   : > { %949 = vmatpush.bf16.msrb.mxu3 %v2548_v6  ;;  %v2566_v6 = vld [vmem:[%s3214_s1 + $0x288] sm:$0xff] }
  0x31   : > { %896 = vmatpush.bf16.msrb.mxu0 %v2523_v8  ;;  %v2558_v8 = vld [vmem:[%s3214_s1 + $0x248] sm:$0xff] }
  0x32   : > { %914 = vmatpush.bf16.msrb.mxu1 %v2531_v9  ;;  %v2574_v9 = vld [vmem:[%s3214_s1 + $0x2c8] sm:$0xff] }
  0x33   : > { %932 = vmatpush.bf16.msrb.mxu2 %v2539_v7  ;;  %v2550_v7 = vld [vmem:[%s3214_s1 + $0x208] sm:$0xff] }
  0x34   : > { %950 = vmatpush.bf16.msrb.mxu3 %v2547_v10  ;;  %v2565_v10 = vld [vmem:[%s3214_s1 + $0x280] sm:$0xff] }
  0x35   : > { %897 = vmatpush.bf16.msrb.mxu0 %v2522_v12  ;;  %v2549_v12 = vld [vmem:[%s3214_s1 + $0x200] sm:$0xff] }
  0x36   : > { %915 = vmatpush.bf16.msrb.mxu1 %v2530_v14  ;;  %v2573_v14 = vld [vmem:[%s3214_s1 + $0x2c0] sm:$0xff] }
  0x37   : > { %933 = vmatpush.bf16.msrb.mxu2 %v2538_v11  ;;  %v2604_v11 = vld [vmem:[%s3214_s1 + $0x3b8] sm:$0xff] }
  0x38   : > { %951 = vmatpush.bf16.msrb.mxu3 %v2546_v16  ;;  %v2588_v16 = vld [vmem:[%s3214_s1 + $0x338] sm:$0xff] }
  0x39   : > { %898 = vmatpush.bf16.msrb.mxu0 %v2521_v18  ;;  %v2612_v18 = vld [vmem:[%s3214_s1 + $0x3f8] sm:$0xff] }
  0x3a   : > { %916 = vmatpush.bf16.msrb.mxu1 %v2529_v21  ;;  %v2587_v21 = vld [vmem:[%s3214_s1 + $0x330] sm:$0xff] }
  0x3b   : > { %934 = vmatpush.bf16.msrb.mxu2 %v2537_v17  ;;  %v2596_v17 = vld [vmem:[%s3214_s1 + $0x378] sm:$0xff] }
  0x3c   : > { %952 = vmatpush.bf16.msrb.mxu3 %v2545_v22  ;;  %579 = vmatmul.bf16.gmra.mxu0 %v2905_v25  ;;  %v2611_v22 = vld [vmem:[%s3214_s1 + $0x3f0] sm:$0xff] }
  0x3d   : > { %899 = vmatpush.bf16.msrb.mxu0 %v2520_v24  ;;  %597 = vmatmul.bf16.gmra.mxu1 %v2907_v26  ;;  %v2594_v24 = vld [vmem:[%s3214_s1 + $0x368] sm:$0xff] }
  0x3e   : > { %615 = vmatmul.bf16.gmra.mxu2 %v2832_v61  ;;  %917 = vmatpush.bf16.msrb.mxu1 %v2528_v27  ;;  %v2586_v27 = vld [vmem:[%s3214_s1 + $0x328] sm:$0xff] }
  0x3f   : > { %935 = vmatpush.bf16.msrb.mxu2 %v2536_v23  ;;  %633 = vmatmul.bf16.gmra.mxu3 %v2834_v63  ;;  %v2602_v23 = vld [vmem:[%s3214_s1 + $0x3a8] sm:$0xff] }
  0x40   : > { %953 = vmatpush.bf16.msrb.mxu3 %v2544_v28  ;;  %v2610_v28 = vld [vmem:[%s3214_s1 + $0x3e8] sm:$0xff] }
  0x41   : > { %900 = vmatpush.bf16.msrb.mxu0 %v2519_v30  ;;  %v2593_v30 = vld [vmem:[%s3214_s1 + $0x360] sm:$0xff] }
  0x42   : > { %918 = vmatpush.bf16.msrb.mxu1 %v2527_v31  ;;  %v2585_v31 = vld [vmem:[%s3214_s1 + $0x320] sm:$0xff] }
  0x43   : > { %936 = vmatpush.bf16.msrb.mxu2 %v2535_v29  ;;  %v2601_v29 = vld [vmem:[%s3214_s1 + $0x3a0] sm:$0xff] }
  0x44   : > { %954 = vmatpush.bf16.msrb.mxu3 %v2543_v32  ;;  %v2609_v32 = vld [vmem:[%s3214_s1 + $0x3e0] sm:$0xff] }
  0x45   : > { %901 = vmatpush.bf16.msrb.mxu0 %v2518_v34  ;;  %v2592_v34 = vld [vmem:[%s3214_s1 + $0x358] sm:$0xff] }
  0x46   : > { %919 = vmatpush.bf16.msrb.mxu1 %v2526_v35  ;;  %v2584_v35 = vld [vmem:[%s3214_s1 + $0x318] sm:$0xff] }
  0x47   : > { %937 = vmatpush.bf16.msrb.mxu2 %v2534_v33  ;;  %v2600_v33 = vld [vmem:[%s3214_s1 + $0x398] sm:$0xff] }
  0x48   : > { %955 = vmatpush.bf16.msrb.mxu3 %v2542_v36  ;;  %v2608_v36 = vld [vmem:[%s3214_s1 + $0x3d8] sm:$0xff] }
  0x49   : > { %902 = vmatpush.bf16.msrb.mxu0 %v2517_v38  ;;  %v2591_v38 = vld [vmem:[%s3214_s1 + $0x350] sm:$0xff] }
  0x4a   : > { %920 = vmatpush.bf16.msrb.mxu1 %v2525_v41  ;;  %v2598_v41 = vld [vmem:[%s3214_s1 + $0x388] sm:$0xff] }
  0x4b   : > { %938 = vmatpush.bf16.msrb.mxu2 %v2533_v37  ;;  %v2599_v37 = vld [vmem:[%s3214_s1 + $0x390] sm:$0xff] }
  0x4c   : > { %956 = vmatpush.bf16.msrb.mxu3 %v2541_v42  ;;  %903 = vmatmul.bf16.vlgmr.msrb.gmra.mxu0 %v2768_v15  ;;  %v2590_v42 = vld [vmem:[%s3214_s1 + $0x348] sm:$0xff] }
  0x4d   : > { %1227 = vmatpush.bf16.msra.mxu0 %v2556_v40  ;;  %921 = vmatmul.bf16.vlgmr.msrb.gmra.mxu1 %v2843_v2  ;;  %v2607_v40 = vld [vmem:[%s3214_s1 + $0x3d0] sm:$0xff] }
  0x4e   : > { %1245 = vmatpush.bf16.msra.mxu1 %v2564_v43  ;;  %939 = vmatmul.bf16.vlgmr.msrb.gmra.mxu2 %v2846_v3  ;;  %v2582_v43 = vld [vmem:[%s3214_s1 + $0x308] sm:$0xff] }
  0x4f   : > { %1263 = vmatpush.bf16.msra.mxu2 %v2572_v39  ;;  %957 = vmatmul.bf16.vlgmr.msrb.gmra.mxu3 %v2849_v4  ;;  %v2583_v39 = vld [vmem:[%s3214_s1 + $0x310] sm:$0xff] }
  0x50   : > { %1281 = vmatpush.bf16.msra.mxu3 %v2580_v44  ;;  %v1644_v44 = vld [vmem:[%s3216_s3] sm:$0xff] }
  0x51   : > { %1228 = vmatpush.bf16.msra.mxu0 %v2555_v46  ;;  %v2597_v46 = vld [vmem:[%s3214_s1 + $0x380] sm:$0xff] }
  0x52   : > { %1246 = vmatpush.bf16.msra.mxu1 %v2563_v47  ;;  %v2589_v47 = vld [vmem:[%s3214_s1 + $0x340] sm:$0xff] }
  0x53   : > { %1264 = vmatpush.bf16.msra.mxu2 %v2571_v45  ;;  %v2606_v45 = vld [vmem:[%s3214_s1 + $0x3c8] sm:$0xff] }
  0x54   : > { %1282 = vmatpush.bf16.msra.mxu3 %v2579_v48  ;;  %v2670_v48 = vmov 0  }
  0x55   : > { %1229 = vmatpush.bf16.msra.mxu0 %v2554_v50  ;;  %2643 = vset.pattern.permute.xlu0 %v2670_v48  ;;  %v2605_v50 = vld [vmem:[%s3214_s1 + $0x3c0] sm:$0xff] }
  0x56   : > { %1247 = vmatpush.bf16.msra.mxu1 %v2562_v51  ;;  %1649 = vperm.xlu0 %2643, %v1644_v44   ;;  %v1645_v51 = vld [vmem:[%s3216_s3 + $0x8] sm:$0xff] }
  0x57   : > { %1265 = vmatpush.bf16.msra.mxu2 %v2570_v49  ;;  %2644 = vset.pattern.permute.xlu1 %v2670_v48  ;;  %v2581_v49 = vld [vmem:[%s3214_s1 + $0x300] sm:$0xff] }
  0x58   : > { %1283 = vmatpush.bf16.msra.mxu3 %v2578_v52  ;;  %v1646_v52 = vld [vmem:[%s3216_s3 + $0x10] sm:$0xf] }
  0x59   : > { %1230 = vmatpush.bf16.msra.mxu0 %v2553_v54  ;;  %1659 = vperm.xlu1 %2644, %v1646_v52  }
  0x5a   : > { %1248 = vmatpush.bf16.msra.mxu1 %v2561_v55 }
  0x5b   : > { %1266 = vmatpush.bf16.msra.mxu2 %v2569_v53 }
  0x5c   : > { %1284 = vmatpush.bf16.msra.mxu3 %v2577_v56  ;;  %908 = vmatmul.bf16.gmra.mxu0 %v2905_v25 }
  0x5d   : > { %1231 = vmatpush.bf16.msra.mxu0 %v2552_v58  ;;  %926 = vmatmul.bf16.gmra.mxu1 %v2907_v26 }
  0x5e   : > { %1249 = vmatpush.bf16.msra.mxu1 %v2560_v59  ;;  %944 = vmatmul.bf16.gmra.mxu2 %v2832_v61 }
  0x5f   : > { %1267 = vmatpush.bf16.msra.mxu2 %v2568_v57  ;;  %962 = vmatmul.bf16.gmra.mxu3 %v2834_v63 }
  0x60   : > { %1285 = vmatpush.bf16.msra.mxu3 %v2576_v60  ;;  %1654 = vperm.xlu0 %2643, %v1645_v51  }
  0x61   : > { %1232 = vmatpush.bf16.msra.mxu0 %v2551_v0 }
  0x62   : > { %1250 = vmatpush.bf16.msra.mxu1 %v2559_v1 }
  0x63   : > { %1268 = vmatpush.bf16.msra.mxu2 %v2567_v62 }
  0x64   : > { %1286 = vmatpush.bf16.msra.mxu3 %v2575_v5 }
  0x65   : > { %1233 = vmatpush.bf16.msra.mxu0 %v2550_v7 }
  0x66   : > { %1251 = vmatpush.bf16.msra.mxu1 %v2558_v8 }
  0x67   : > { %1269 = vmatpush.bf16.msra.mxu2 %v2566_v6 }
  0x68   : > { %1287 = vmatpush.bf16.msra.mxu3 %v2574_v9 }
  0x69   : > { %1234 = vmatpush.bf16.msra.mxu0 %v2549_v12 }
  0x6a   : > { %1252 = vmatpush.bf16.msra.mxu1 %v2557_v13 }
  0x6b   : > { %1270 = vmatpush.bf16.msra.mxu2 %v2565_v10 }
  0x6c   : > { %1288 = vmatpush.bf16.msra.mxu3 %v2573_v14  ;;  %1235 = vmatmul.bf16.vlgmr.msra.gmra.mxu0 %v2768_v15 }
  0x6d   : > { %1559 = vmatpush.bf16.msrb.mxu0 %v2588_v16  ;;  %1253 = vmatmul.bf16.vlgmr.msra.gmra.mxu1 %v2843_v2 }
  0x6e   : > { %1577 = vmatpush.bf16.msrb.mxu1 %v2596_v17  ;;  %1271 = vmatmul.bf16.vlgmr.msra.gmra.mxu2 %v2846_v3 }
  0x6f   : > { %1595 = vmatpush.bf16.msrb.mxu2 %v2604_v11  ;;  %1289 = vmatmul.bf16.vlgmr.msra.gmra.mxu3 %v2849_v4 }
  0x70   : > { %1613 = vmatpush.bf16.msrb.mxu3 %v2612_v18 }
  0x71   : > { %1560 = vmatpush.bf16.msrb.mxu0 %v2587_v21 }
  0x72   : > { %1578 = vmatpush.bf16.msrb.mxu1 %v2595_v20 }
  0x73   : > { %1596 = vmatpush.bf16.msrb.mxu2 %v2603_v19 }
  0x74   : > { %1614 = vmatpush.bf16.msrb.mxu3 %v2611_v22 }
  0x75   : > { %1561 = vmatpush.bf16.msrb.mxu0 %v2586_v27 }
  0x76   : > { %1579 = vmatpush.bf16.msrb.mxu1 %v2594_v24 }
  0x77   : > { %1597 = vmatpush.bf16.msrb.mxu2 %v2602_v23 }
  0x78   : > { %1615 = vmatpush.bf16.msrb.mxu3 %v2610_v28 }
  0x79   : > { %1562 = vmatpush.bf16.msrb.mxu0 %v2585_v31 }
  0x7a   : > { %1580 = vmatpush.bf16.msrb.mxu1 %v2593_v30 }
  0x7b   : > { %1598 = vmatpush.bf16.msrb.mxu2 %v2601_v29 }
  0x7c   : > { %1616 = vmatpush.bf16.msrb.mxu3 %v2609_v32  ;;  %1240 = vmatmul.bf16.gmra.mxu0 %v2905_v25 }
  0x7d   : > { %1563 = vmatpush.bf16.msrb.mxu0 %v2584_v35  ;;  %1258 = vmatmul.bf16.gmra.mxu1 %v2907_v26 }
  0x7e   : > { %1581 = vmatpush.bf16.msrb.mxu1 %v2592_v34  ;;  %1276 = vmatmul.bf16.gmra.mxu2 %v2832_v61 }
  0x7f   : > { %1599 = vmatpush.bf16.msrb.mxu2 %v2600_v33  ;;  %1294 = vmatmul.bf16.gmra.mxu3 %v2834_v63 }
  0x80   : > { %1617 = vmatpush.bf16.msrb.mxu3 %v2608_v36 }
  0x81   : > { %1564 = vmatpush.bf16.msrb.mxu0 %v2583_v39 }
  0x82   : > { %1582 = vmatpush.bf16.msrb.mxu1 %v2591_v38 }
  0x83   : > { %1600 = vmatpush.bf16.msrb.mxu2 %v2599_v37 }
  0x84   : > { %1618 = vmatpush.bf16.msrb.mxu3 %v2607_v40 }
  0x85   : > { %1565 = vmatpush.bf16.msrb.mxu0 %v2582_v43 }
  0x86   : > { %1583 = vmatpush.bf16.msrb.mxu1 %v2590_v42 }
  0x87   : > { %1601 = vmatpush.bf16.msrb.mxu2 %v2598_v41 }
  0x88   : > { %1619 = vmatpush.bf16.msrb.mxu3 %v2606_v45 }
  0x89   : > { %1566 = vmatpush.bf16.msrb.mxu0 %v2581_v49 }
  0x8a   : > { %1584 = vmatpush.bf16.msrb.mxu1 %v2589_v47 }
  0x8b   : > { %1602 = vmatpush.bf16.msrb.mxu2 %v2597_v46 }
  0x8c   : > { %1620 = vmatpush.bf16.msrb.mxu3 %v2605_v50  ;;  %1567 = vmatmul.bf16.vlgmr.msrb.gmra.mxu0 %v2768_v15 }
  0x8d   : > { %1585 = vmatmul.bf16.vlgmr.msrb.gmra.mxu1 %v2843_v2 }
  0x8e   : > { %1603 = vmatmul.bf16.vlgmr.msrb.gmra.mxu2 %v2846_v3 }
  0x8f   : > { %1621 = vmatmul.bf16.vlgmr.msrb.gmra.mxu3 %v2849_v4 }
  0x9c   : > { %1572 = vmatmul.bf16.gmra.mxu0 %v2905_v25 }
  0x9d   : > { %1590 = vmatmul.bf16.gmra.mxu1 %v2907_v26 }
  0x9e   : > { %1608 = vmatmul.bf16.gmra.mxu2 %v2832_v61 }
  0x9f   : > { %1626 = vmatmul.bf16.gmra.mxu3 %v2834_v63 }
  0xa9   : > { %v575_v15 = vpop.f32.mrf.mxu0 }
  0xaa   : > { %v593_v53 = vpop.f32.mrf.mxu1 }
  0xab   : > { %v594_v2 = vadd.f32 %v593_v53, %v575_v15 }
  0xb1   : > { %v611_v54 = vpop.f32.mrf.mxu2  ;;  %v577_v4 = vpop.f32.mrf.mxu0 }
  0xb2   : > { %v629_v3 = vpop.f32.mrf.mxu3  ;;  %v612_v55 = vadd.f32 %v611_v54, %v594_v2  ;;  %v595_v56 = vpop.f32.mrf.mxu1 }
  0xb3   : > { %v596_v57 = vadd.f32 %v595_v56, %v577_v4 }
  0xb4   : > { %v3180_v58 = vadd.f32 %v629_v3, %v612_v55 }
  0xb9   : > { %v613_v59 = vpop.f32.mrf.mxu2  ;;  %v580_v62 = vpop.f32.mrf.mxu0 }
  0xba   : > { %v631_v60 = vpop.f32.mrf.mxu3  ;;  %v614_v25 = vadd.f32 %v613_v59, %v596_v57  ;;  %v598_v26 = vpop.f32.mrf.mxu1 }
  0xbb   : > { %v599_v0 = vadd.f32 %v598_v26, %v580_v62 }
  0xbc   : > { %v3182_v61 = vadd.f32 %v631_v60, %v614_v25 }
  0xc1   : > { %v616_v63 = vpop.f32.mrf.mxu2  ;;  %v582_v6 = vpop.f32.mrf.mxu0 }
  0xc2   : > { %v634_v1 = vpop.f32.mrf.mxu3  ;;  %v617_v5 = vadd.f32 %v616_v63, %v599_v0  ;;  %v600_v7 = vpop.f32.mrf.mxu1  ;;  %v2645_v6 = vld [vmem:[%s3215_s2] ss:$0 sm:$0xff] }
  0xc4   : > { %v3184_v8 = vadd.f32 %v634_v1, %v617_v5 }
  0xc9   : > { %v618_v9 = vpop.f32.mrf.mxu2  ;;  %v904_v11 = vpop.f32.mrf.mxu0 }
  0xca   : > { %v636_v10 = vpop.f32.mrf.mxu3  ;;  %v922_v12 = vpop.f32.mrf.mxu1 }
  0xcb   : > { %v923_v13 = vadd.f32 %v922_v12, %v904_v11  ;;  %v1650_v9 = vpop.permute.xlu0 %1649 }
  0xd1   : > { %v940_v14 = vpop.f32.mrf.mxu2  ;;  %v906_v18 = vpop.f32.mrf.mxu0 }
  0xd2   : > { %v941_v16 = vadd.f32 %v940_v14, %v923_v13  ;;  %v958_v17 = vpop.f32.mrf.mxu3  ;;  %v924_v19 = vpop.f32.mrf.mxu1 }
  0xd3   : > { %v925_v21 = vadd.f32 %v924_v19, %v906_v18 }
  0xd4   : > { %v959_v20 = vadd.f32 %v958_v17, %v941_v16 }
  0xd6   : > { %v967_v22 = vmax.f32 %v3180_v58, %v959_v20 }
  0xd9   : > { %v942_v23 = vpop.f32.mrf.mxu2  ;;  %v909_v28 = vpop.f32.mrf.mxu0 }
  0xda   : > { %v943_v24 = vadd.f32 %v942_v23, %v925_v21  ;;  %v960_v27 = vpop.f32.mrf.mxu3  ;;  %v927_v29 = vpop.f32.mrf.mxu1 }
  0xdb   : > { %v928_v31 = vadd.f32 %v927_v29, %v909_v28 }
  0xdc   : > { %v961_v30 = vadd.f32 %v960_v27, %v943_v24 }
  0xde   : > { %v968_v32 = vmax.f32 %v3182_v61, %v961_v30 }
  0xe1   : > { %v945_v33 = vpop.f32.mrf.mxu2  ;;  %v911_v36 = vpop.f32.mrf.mxu0 }
  0xe2   : > { %v946_v34 = vadd.f32 %v945_v33, %v928_v31  ;;  %v963_v35 = vpop.f32.mrf.mxu3  ;;  %v929_v37 = vpop.f32.mrf.mxu1 }
  0xe4   : > { %v3188_v38 = vadd.f32 %v963_v35, %v946_v34  ;;  %v1655_v34 = vpop.permute.xlu0 %1654 }
  0xe6   : > { %v969_v39 = vmax.f32 %v3184_v8, %v3188_v38 }
  0xe9   : > { %v947_v40 = vpop.f32.mrf.mxu2  ;;  %v1236_v42 = vpop.f32.mrf.mxu0 }
  0xea   : > { %v965_v41 = vpop.f32.mrf.mxu3  ;;  %v1254_v43 = vpop.f32.mrf.mxu1 }
  0xeb   : > { %v1255_v54 = vadd.f32 %v1254_v43, %v1236_v42 }
  0xf1   : > { %v1272_v44 = vpop.f32.mrf.mxu2  ;;  %v1238_v46 = vpop.f32.mrf.mxu0 }
  0xf2   : > { %v1290_v45 = vpop.f32.mrf.mxu3  ;;  %v1256_v47 = vpop.f32.mrf.mxu1  ;;  %v1273_v57 = vadd.f32 %v1272_v44, %v1255_v54 }
  0xf3   : > { %v1257_v25 = vadd.f32 %v1256_v47, %v1238_v46 }
  0xf4   : > { %v1291_v59 = vadd.f32 %v1290_v45, %v1273_v57 }
  0xf6   : > { %v1299_v63 = vmax.f32 %v967_v22, %v1291_v59 }
  0xf9   : > { %v1274_v48 = vpop.f32.mrf.mxu2  ;;  %v1241_v50 = vpop.f32.mrf.mxu0 }
  0xfa   : > { %v1292_v49 = vpop.f32.mrf.mxu3  ;;  %v1259_v51 = vpop.f32.mrf.mxu1  ;;  %v1275_v1 = vadd.f32 %v1274_v48, %v1257_v25 }
  0xfb   : > { %v1260_v11 = vadd.f32 %v1259_v51, %v1241_v50  ;;  %v1660_v48 = vpop.permute.xlu1 %1659 }
  0xfc   : > { %v1293_v10 = vadd.f32 %v1292_v49, %v1275_v1 }
  0xfe   : > { %v1300_v21 = vmax.f32 %v968_v32, %v1293_v10 }
 0x101   : > { %v1277_v52 = vpop.f32.mrf.mxu2  ;;  %v1243_v53 = vpop.f32.mrf.mxu0 }
 0x102   : > { %v1295_v15 = vpop.f32.mrf.mxu3  ;;  %v1261_v2 = vpop.f32.mrf.mxu1  ;;  %v1278_v22 = vadd.f32 %v1277_v52, %v1260_v11 }
 0x104   : > { %v1296_v30 = vadd.f32 %v1295_v15, %v1278_v22 }
 0x106   : > { %v1301_v41 = vmax.f32 %v969_v39, %v1296_v30 }
 0x109   : > { %v1279_v3 = vpop.f32.mrf.mxu2  ;;  %v1568_v4 = vpop.f32.mrf.mxu0 }
 0x10a   : > { %v1297_v55 = vpop.f32.mrf.mxu3  ;;  %v1586_v56 = vpop.f32.mrf.mxu1 }
 0x10b   : > { %v1587_v58 = vadd.f32 %v1586_v56, %v1568_v4 }
 0x111   : > { %v1604_v60 = vpop.f32.mrf.mxu2  ;;  %v1570_v0 = vpop.f32.mrf.mxu0 }
 0x112   : > { %v1605_v62 = vadd.f32 %v1604_v60, %v1587_v58  ;;  %v1622_v26 = vpop.f32.mrf.mxu3  ;;  %v1588_v61 = vpop.f32.mrf.mxu1 }
 0x113   : > { %v1589_v12 = vadd.f32 %v1588_v61, %v1570_v0 }
 0x114   : > { %v1623_v5 = vadd.f32 %v1622_v26, %v1605_v62 }
 0x116   : > { %v1631_v7 = vmax.f32 %v1299_v63, %v1623_v5 }
 0x118   : > { %v1638_v13 = vadd.f32 %v2645_v6, %v1631_v7 }
 0x119   : > { %v1606_v14 = vpop.f32.mrf.mxu2  ;;  %v1573_v19 = vpop.f32.mrf.mxu0 }
 0x11a   : > { %v1607_v16 = vadd.f32 %v1606_v14, %v1589_v12  ;;  %v1624_v17 = vpop.f32.mrf.mxu3  ;;  %v1641_v18 = vmax.f32 %v1638_v13, 0.0  ;;  %v1591_v20 = vpop.f32.mrf.mxu1 }
 0x11b   : > { %v1592_v29 = vadd.f32 %v1591_v20, %v1573_v19 }
 0x11c   : > { %v1625_v23 = vadd.f32 %v1624_v17, %v1607_v16  ;;  %v1662_v24 = vmul.f32 %v1650_v9, %v1641_v18 }
 0x11e   : > { %v1632_v27 = vmax.f32 %v1300_v21, %v1625_v23  ;;  %v1665_v28 = vpack.c.bf16 %v1662_v24, %v1662_v24 }
 0x120   : > { %1669 = vst.msk [vmem:[%s233_s29] sm:$0xf] %vm1668_vm3, %v1665_v28  ;;  %v1639_v31 = vadd.f32 %v2645_v6, %v1632_v27 }
 0x121   : > { %v1609_v33 = vpop.f32.mrf.mxu2  ;;  %v1575_v37 = vpop.f32.mrf.mxu0 }
 0x122   : > { %v1610_v35 = vadd.f32 %v1609_v33, %v1592_v29  ;;  %v1627_v36 = vpop.f32.mrf.mxu3  ;;  %v1642_v32 = vmax.f32 %v1639_v31, 0.0  ;;  %v1593_v40 = vpop.f32.mrf.mxu1 }
 0x124   : > { %v1628_v42 = vadd.f32 %v1627_v36, %v1610_v35  ;;  %v1663_v43 = vmul.f32 %v1655_v34, %v1642_v32 }
 0x126   : > { %v1633_v44 = vmax.f32 %v1301_v41, %v1628_v42  ;;  %v1666_v45 = vpack.c.bf16 %v1663_v43, %v1663_v43 }
 0x128   : > { %1670 = vst.msk [vmem:[%s233_s29 + $0x4] sm:$0xf] %vm1668_vm3, %v1666_v45  ;;  %v1640_v46 = vadd.f32 %v2645_v6, %v1633_v44 }
 0x129   : > { %v1611_v47 = vpop.f32.mrf.mxu2 }
 0x12a   : > { %v1629_v49 = vpop.f32.mrf.mxu3  ;;  %v1643_v50 = vmax.f32 %v1640_v46, 0.0 }
 0x12c   : > { %v1664_v51 = vmul.f32 %v1660_v48, %v1643_v50 }
 0x12e   : > { %v1667_v52 = vpack.c.bf16 %v1664_v51, %v1664_v51 }
 0x130   : > { %1672 = vst.msk [vmem:[%s233_s29 + $0x8] sm:$0x3] %vm1671_vm4, %v1667_v52 }
 0x131 PF: > { %s14_s17 = sadd.s32 1, %s2668_s17   ;;  %s3218_s15 = smov %s2664_s16 }
 0x132   : > { %p11_p5 = scmp.ge.s32.totalorder %s14_s17, 4   ;;  %s3219_s16 = smov %s3221_s18 }
 0x134   :  { %13 = sbr.rel (!%p11_p5) target bundleno = 2 (0x2), region = 69 }

// kernel: cnn_forward.5
= control target key start
LH: loop header
LB: loop body
LE: loop exit
PB: predicated region body
PF: predicated region fallthrough
CT: control target
= control target key end

     0   :  { %s1674_s0 = inlined_call_operand.vmem [shape: bf16[2,1280], index: 0, kind: input, shape index: {}]   ;;  %s1675_s1 = inlined_call_operand.vmem [shape: bf16[1280,128], index: 1, kind: input, shape index: {}]   ;;  %s1676_s2 = inlined_call_operand.vmem [shape: f32[1,128], index: 2, kind: input, shape index: {}]   ;;  %s1677_s3 = inlined_call_operand.vmem [shape: f32[128,5], index: 3, kind: input, shape index: {}]   ;;  %s1678_s4 = inlined_call_operand.vmem [shape: f32[1,5], index: 4, kind: input, shape index: {}]   ;;  %s1679_s5 = inlined_call_operand.hbm [shape: f32[2,5], index: 5, kind: output, shape index: {}]  }
   0x1   :  { %v1224_v0 = vld [vmem:[%s1675_s1 + $0x38] sm:$0xff]  ;;  %v1223_v4 = vld [vmem:[%s1675_s1 + $0x30] sm:$0xff]  ;;  %v1222_v8 = vld [vmem:[%s1675_s1 + $0x28] sm:$0xff] }
   0x2   :  { %v1232_v1 = vld [vmem:[%s1675_s1 + $0x78] sm:$0xff]  ;;  %697 = vmatpush.bf16.msra.mxu0 %v1224_v0  ;;  %v1231_v5 = vld [vmem:[%s1675_s1 + $0x70] sm:$0xff]  ;;  %v1230_v9 = vld [vmem:[%s1675_s1 + $0x68] sm:$0xff] }
   0x3   :  { %v1240_v2 = vld [vmem:[%s1675_s1 + $0xb8] sm:$0xff]  ;;  %710 = vmatpush.bf16.msra.mxu1 %v1232_v1  ;;  %v1239_v6 = vld [vmem:[%s1675_s1 + $0xb0] sm:$0xff]  ;;  %v1238_v10 = vld [vmem:[%s1675_s1 + $0xa8] sm:$0xff] }
   0x4   :  { %v1248_v3 = vld [vmem:[%s1675_s1 + $0xf8] sm:$0xff]  ;;  %723 = vmatpush.bf16.msra.mxu2 %v1240_v2  ;;  %v1247_v7 = vld [vmem:[%s1675_s1 + $0xf0] sm:$0xff]  ;;  %v1246_v11 = vld [vmem:[%s1675_s1 + $0xe8] sm:$0xff] }
   0x5   :  { %736 = vmatpush.bf16.msra.mxu3 %v1248_v3  ;;  %v1221_v12 = vld [vmem:[%s1675_s1 + $0x20] sm:$0xff]  ;;  %v1220_v16 = vld [vmem:[%s1675_s1 + $0x18] sm:$0xff]  ;;  %v1219_v21 = vld [vmem:[%s1675_s1 + $0x10] sm:$0xff] }
   0x6   :  { %698 = vmatpush.bf16.msra.mxu0 %v1223_v4  ;;  %v1229_v13 = vld [vmem:[%s1675_s1 + $0x60] sm:$0xff]  ;;  %v1228_v17 = vld [vmem:[%s1675_s1 + $0x58] sm:$0xff]  ;;  %v1227_v22 = vld [vmem:[%s1675_s1 + $0x50] sm:$0xff] }
   0x7   :  { %711 = vmatpush.bf16.msra.mxu1 %v1231_v5  ;;  %v1237_v14 = vld [vmem:[%s1675_s1 + $0xa0] sm:$0xff]  ;;  %v1236_v18 = vld [vmem:[%s1675_s1 + $0x98] sm:$0xff]  ;;  %v1235_v23 = vld [vmem:[%s1675_s1 + $0x90] sm:$0xff] }
   0x8   :  { %724 = vmatpush.bf16.msra.mxu2 %v1239_v6  ;;  %v1245_v15 = vld [vmem:[%s1675_s1 + $0xe0] sm:$0xff]  ;;  %v1244_v19 = vld [vmem:[%s1675_s1 + $0xd8] sm:$0xff]  ;;  %v1243_v24 = vld [vmem:[%s1675_s1 + $0xd0] sm:$0xff] }
   0x9   :  { %737 = vmatpush.bf16.msra.mxu3 %v1247_v7  ;;  %v31_v20 = vld [vmem:[%s1674_s0] sm:$0xff] }
   0xa   :  { %699 = vmatpush.bf16.msra.mxu0 %v1222_v8  ;;  %194 = vst [vmem:[#allocation1] ss:$9 sm:$0xff] %v31_v20 }
   0xb   :  { %712 = vmatpush.bf16.msra.mxu1 %v1230_v9 }
   0xc   :  { %725 = vmatpush.bf16.msra.mxu2 %v1238_v10 }
   0xd   :  { %738 = vmatpush.bf16.msra.mxu3 %v1246_v11 }
   0xe   :  { %700 = vmatpush.bf16.msra.mxu0 %v1221_v12 }
   0xf   :  { %713 = vmatpush.bf16.msra.mxu1 %v1229_v13 }
  0x10   :  { %726 = vmatpush.bf16.msra.mxu2 %v1237_v14 }
  0x11   :  { %739 = vmatpush.bf16.msra.mxu3 %v1245_v15 }
  0x12   :  { %701 = vmatpush.bf16.msra.mxu0 %v1220_v16 }
  0x13   :  { %714 = vmatpush.bf16.msra.mxu1 %v1228_v17 }
  0x14   :  { %727 = vmatpush.bf16.msra.mxu2 %v1236_v18 }
  0x15   :  { %740 = vmatpush.bf16.msra.mxu3 %v1244_v19 }
  0x16   :  { %10 = vsyncpa [#allocation4], 0  ;;  %702 = vmatpush.bf16.msra.mxu0 %v1219_v21  ;;  %v1218_v25 = vld [vmem:[%s1675_s1 + $0x8] sm:$0xff]  ;;  %v1217_v29 = vld [vmem:[%s1675_s1] sm:$0xff]  ;;  %s1328_s10 = smov [#allocation3]   ;;  %s888_s14 = sshll.u32 %s1679_s5, 4  ;;  %s889_s14 = int_to_ptr.hbm [resolvable:$true] %s888_s14 }
  0x17   :  { %715 = vmatpush.bf16.msra.mxu1 %v1227_v22  ;;  %v1226_v26 = vld [vmem:[%s1675_s1 + $0x48] sm:$0xff]  ;;  %v1225_v30 = vld [vmem:[%s1675_s1 + $0x40] sm:$0xff]  ;;  %v1256_v32 = vld [vmem:[%s1675_s1 + $0x138] sm:$0xff]  ;;  %s886_s11 = sshll.u32 %s1328_s10, 4  ;;  %vm879_vm0 = vcmask 33792   ;;  %s887_s11 = int_to_ptr.vmem [resolvable:$true] %s886_s11 }
  0x18   :  { %728 = vmatpush.bf16.msra.mxu2 %v1235_v23  ;;  %v1234_v27 = vld [vmem:[%s1675_s1 + $0x88] sm:$0xff]  ;;  %v1233_v31 = vld [vmem:[%s1675_s1 + $0x80] sm:$0xff]  ;;  %v1264_v33 = vld [vmem:[%s1675_s1 + $0x178] sm:$0xff] }
  0x19   :  { %741 = vmatpush.bf16.msra.mxu3 %v1243_v24  ;;  %v1242_v28 = vld [vmem:[%s1675_s1 + $0xc8] sm:$0xff]  ;;  %v1272_v34 = vld [vmem:[%s1675_s1 + $0x1b8] sm:$0xff]  ;;  %v1241_v35 = vld [vmem:[%s1675_s1 + $0xc0] sm:$0xff] }
  0x1a   :  { %703 = vmatpush.bf16.msra.mxu0 %v1218_v25  ;;  %v1280_v36 = vld [vmem:[%s1675_s1 + $0x1f8] sm:$0xff]  ;;  %v195_v37 = vld [vmem:[#allocation1] sm:$0xff]  ;;  %v1255_v38 = vld [vmem:[%s1675_s1 + $0x130] sm:$0xff] }
  0x1b   :  { %716 = vmatpush.bf16.msra.mxu1 %v1226_v26  ;;  %v1263_v39 = vld [vmem:[%s1675_s1 + $0x170] sm:$0xff]  ;;  %v198_v44 = vld [vmem:[#allocation1 + $0x1b] sm:$0xff]  ;;  %v1484_v46 = vld [vmem:[#allocation1 + $0x24] sm:$0xff] }
  0x1c   :  { %729 = vmatpush.bf16.msra.mxu2 %v1234_v27  ;;  %v197_v40 = vld [vmem:[#allocation1 + $0x12] sm:$0xff]  ;;  %v196_v43 = vld [vmem:[#allocation1 + $0x9] sm:$0xff]  ;;  %v1486_v47 = vld [vmem:[#allocation1 + $0x3f] sm:$0xff] }
  0x1d   :  { %742 = vmatpush.bf16.msra.mxu3 %v1242_v28  ;;  %v1271_v41 = vld [vmem:[%s1675_s1 + $0x1b0] sm:$0xff]  ;;  %v32_v48 = vld [vmem:[%s1674_s0 + $0x8] sm:$0x3]  ;;  %v1253_v54 = vld [vmem:[%s1675_s1 + $0x120] sm:$0xff] }
  0x1e   :  { %704 = vmatpush.bf16.msra.mxu0 %v1217_v29  ;;  %v1279_v42 = vld [vmem:[%s1675_s1 + $0x1f0] sm:$0xff]  ;;  %v1254_v50 = vld [vmem:[%s1675_s1 + $0x128] sm:$0xff]  ;;  %v1261_v55 = vld [vmem:[%s1675_s1 + $0x160] sm:$0xff] }
  0x1f   :  { %717 = vmatpush.bf16.msra.mxu1 %v1225_v30  ;;  %v1482_v45 = vld [vmem:[#allocation1 + $0x36] sm:$0xff]  ;;  %v1491_v49 = vld [vmem:[#allocation1 + $0x2d] sm:$0xff]  ;;  %v1269_v56 = vld [vmem:[%s1675_s1 + $0x1a0] sm:$0xff] }
  0x20   :  { %730 = vmatpush.bf16.msra.mxu2 %v1233_v31  ;;  %204 = vst [vmem:[#allocation1] ss:$9 sm:$0xff] %v32_v48  ;;  %v1262_v51 = vld [vmem:[%s1675_s1 + $0x168] sm:$0xff]  ;;  %v1277_v57 = vld [vmem:[%s1675_s1 + $0x1e0] sm:$0xff]  ;;  %v1252_v58 = vld [vmem:[%s1675_s1 + $0x118] sm:$0xff] }
  0x21   :  { %743 = vmatpush.bf16.msra.mxu3 %v1241_v35  ;;  %705 = vmatmul.bf16.vlgmr.msra.gmra.mxu0 %v195_v37  ;;  %v1270_v52 = vld [vmem:[%s1675_s1 + $0x1a8] sm:$0xff]  ;;  %v1260_v59 = vld [vmem:[%s1675_s1 + $0x158] sm:$0xff]  ;;  %v1251_v62 = vld [vmem:[%s1675_s1 + $0x110] sm:$0xff] }
  0x22   :  { %749 = vmatpush.bf16.msrb.mxu0 %v1256_v32  ;;  %718 = vmatmul.bf16.vlgmr.msra.gmra.mxu1 %v196_v43  ;;  %v1278_v53 = vld [vmem:[%s1675_s1 + $0x1e8] sm:$0xff]  ;;  %v1268_v60 = vld [vmem:[%s1675_s1 + $0x198] sm:$0xff]  ;;  %v1259_v63 = vld [vmem:[%s1675_s1 + $0x150] sm:$0xff] }
  0x23   :  { %762 = vmatpush.bf16.msrb.mxu1 %v1264_v33  ;;  %731 = vmatmul.bf16.vlgmr.msra.gmra.mxu2 %v197_v40  ;;  %v1276_v61 = vld [vmem:[%s1675_s1 + $0x1d8] sm:$0xff]  ;;  %v1267_v0 = vld [vmem:[%s1675_s1 + $0x190] sm:$0xff]  ;;  %v1250_v2 = vld [vmem:[%s1675_s1 + $0x108] sm:$0xff] }
  0x24   :  { %775 = vmatpush.bf16.msrb.mxu2 %v1272_v34  ;;  %744 = vmatmul.bf16.vlgmr.msra.gmra.mxu3 %v198_v44  ;;  %v1275_v1 = vld [vmem:[%s1675_s1 + $0x1d0] sm:$0xff]  ;;  %v1258_v3 = vld [vmem:[%s1675_s1 + $0x148] sm:$0xff]  ;;  %v1249_v6 = vld [vmem:[%s1675_s1 + $0x100] sm:$0xff] }
  0x25   :  { %788 = vmatpush.bf16.msrb.mxu3 %v1280_v36  ;;  %v1266_v4 = vld [vmem:[%s1675_s1 + $0x188] sm:$0xff]  ;;  %v1257_v7 = vld [vmem:[%s1675_s1 + $0x140] sm:$0xff]  ;;  %v1288_v9 = vld [vmem:[%s1675_s1 + $0x238] sm:$0xff] }
  0x26   :  { %750 = vmatpush.bf16.msrb.mxu0 %v1255_v38  ;;  %v1274_v5 = vld [vmem:[%s1675_s1 + $0x1c8] sm:$0xff]  ;;  %v1265_v8 = vld [vmem:[%s1675_s1 + $0x180] sm:$0xff]  ;;  %v1296_v10 = vld [vmem:[%s1675_s1 + $0x278] sm:$0xff] }
  0x27   :  { %763 = vmatpush.bf16.msrb.mxu1 %v1263_v39  ;;  %v1273_v11 = vld [vmem:[%s1675_s1 + $0x1c0] sm:$0xff]  ;;  %v1287_v12 = vld [vmem:[%s1675_s1 + $0x230] sm:$0xff]  ;;  %v1286_v14 = vld [vmem:[%s1675_s1 + $0x228] sm:$0xff] }
  0x28   :  { %776 = vmatpush.bf16.msrb.mxu2 %v1271_v41  ;;  %v1295_v13 = vld [vmem:[%s1675_s1 + $0x270] sm:$0xff]  ;;  %v1294_v15 = vld [vmem:[%s1675_s1 + $0x268] sm:$0xff]  ;;  %v1285_v16 = vld [vmem:[%s1675_s1 + $0x220] sm:$0xff] }
  0x29   :  { %789 = vmatpush.bf16.msrb.mxu3 %v1279_v42  ;;  %v1293_v17 = vld [vmem:[%s1675_s1 + $0x260] sm:$0xff]  ;;  %v1284_v18 = vld [vmem:[%s1675_s1 + $0x218] sm:$0xff]  ;;  %v1283_v20 = vld [vmem:[%s1675_s1 + $0x210] sm:$0xff]  ;;  %v1327_v42 = vmov 0.0  }
  0x2a   :  { %751 = vmatpush.bf16.msrb.mxu0 %v1254_v50  ;;  %v1292_v19 = vld [vmem:[%s1675_s1 + $0x258] sm:$0xff]  ;;  %v1291_v21 = vld [vmem:[%s1675_s1 + $0x250] sm:$0xff]  ;;  %v1282_v22 = vld [vmem:[%s1675_s1 + $0x208] sm:$0xff]  ;;  %27 = vst [vmem:[#allocation2] sm:$0x3] %v1327_v42 }
  0x2b   :  { %764 = vmatpush.bf16.msrb.mxu1 %v1262_v51  ;;  %v1290_v23 = vld [vmem:[%s1675_s1 + $0x248] sm:$0xff]  ;;  %v1281_v24 = vld [vmem:[%s1675_s1 + $0x200] sm:$0xff]  ;;  %v854_v32 = vld [vmem:[%s1677_s3 + $0x78] sm:$0xff] }
  0x2c   :  { %777 = vmatpush.bf16.msrb.mxu2 %v1270_v52  ;;  %v1289_v25 = vld [vmem:[%s1675_s1 + $0x240] sm:$0xff]  ;;  %v206_v27 = vld [vmem:[#allocation1 + $0x9] sm:$0xff]  ;;  %v850_v38 = vld [vmem:[%s1677_s3 + $0x58] sm:$0xff] }
  0x2d   :  { %790 = vmatpush.bf16.msrb.mxu3 %v1278_v53  ;;  %v205_v26 = vld [vmem:[#allocation1] sm:$0xff]  ;;  %v853_v33 = vld [vmem:[%s1677_s3 + $0x70] sm:$0xff]  ;;  %v852_v36 = vld [vmem:[%s1677_s3 + $0x68] sm:$0xff] }
  0x2e   :  { %752 = vmatpush.bf16.msrb.mxu0 %v1253_v54  ;;  %v851_v37 = vld [vmem:[%s1677_s3 + $0x60] sm:$0xff]  ;;  %v849_v40 = vld [vmem:[%s1677_s3 + $0x50] sm:$0xff]  ;;  %v848_v43 = vld [vmem:[%s1677_s3 + $0x48] sm:$0xff] }
  0x2f   :  { %765 = vmatpush.bf16.msrb.mxu1 %v1261_v55  ;;  %v847_v44 = vld [vmem:[%s1677_s3 + $0x40] sm:$0xff]  ;;  %v845_v48 = vld [vmem:[%s1677_s3 + $0x30] sm:$0xff]  ;;  %v844_v50 = vld [vmem:[%s1677_s3 + $0x28] sm:$0xff] }
  0x30   :  { %778 = vmatpush.bf16.msrb.mxu2 %v1269_v56  ;;  %v843_v51 = vld [vmem:[%s1677_s3 + $0x20] sm:$0xff]  ;;  %v842_v53 = vld [vmem:[%s1677_s3 + $0x18] sm:$0xff] }
  0x31   :  { %791 = vmatpush.bf16.msrb.mxu3 %v1277_v57  ;;  %v841_v57 = vld [vmem:[%s1677_s3 + $0x10] sm:$0xff] }
  0x32   :  { %753 = vmatpush.bf16.msrb.mxu0 %v1252_v58 }
  0x33   :  { %766 = vmatpush.bf16.msrb.mxu1 %v1260_v59  ;;  %v840_v59 = vld [vmem:[%s1677_s3 + $0x8] sm:$0xff] }
  0x34   :  { %779 = vmatpush.bf16.msrb.mxu2 %v1268_v60 }
  0x35   :  { %792 = vmatpush.bf16.msrb.mxu3 %v1276_v61  ;;  %v839_v61 = vld [vmem:[%s1677_s3] sm:$0xff] }
  0x36   :  { %754 = vmatpush.bf16.msrb.mxu0 %v1251_v62 }
  0x37   :  { %767 = vmatpush.bf16.msrb.mxu1 %v1259_v63 }
  0x38   :  { %780 = vmatpush.bf16.msrb.mxu2 %v1267_v0 }
  0x39   :  { %793 = vmatpush.bf16.msrb.mxu3 %v1275_v1 }
  0x3a   :  { %755 = vmatpush.bf16.msrb.mxu0 %v1250_v2 }
  0x3b   :  { %768 = vmatpush.bf16.msrb.mxu1 %v1258_v3 }
  0x3c   :  { %781 = vmatpush.bf16.msrb.mxu2 %v1266_v4 }
  0x3d   :  { %794 = vmatpush.bf16.msrb.mxu3 %v1274_v5 }
  0x3e   :  { %756 = vmatpush.bf16.msrb.mxu0 %v1249_v6 }
  0x3f   :  { %769 = vmatpush.bf16.msrb.mxu1 %v1257_v7  ;;  %v30_v7 = vld [vmem:[#allocation2] sm:$0x3] }
  0x40   :  { %782 = vmatpush.bf16.msrb.mxu2 %v1265_v8 }
  0x41   :  { %795 = vmatpush.bf16.msrb.mxu3 %v1273_v11  ;;  %757 = vmatmul.bf16.vlgmr.msrb.gmra.mxu0 %v1484_v46 }
  0x42   :  { %801 = vmatpush.bf16.msra.mxu0 %v1288_v9  ;;  %770 = vmatmul.bf16.vlgmr.msrb.gmra.mxu1 %v1491_v49 }
  0x43   :  { %814 = vmatpush.bf16.msra.mxu1 %v1296_v10  ;;  %783 = vmatmul.bf16.vlgmr.msrb.gmra.mxu2 %v1482_v45 }
  0x44   :  { %796 = vmatmul.bf16.vlgmr.msrb.gmra.mxu3 %v1486_v47  ;;  %859 = vmatpush.msra.mxu2 %v854_v32  ;;  %v846_v47 = vld [vmem:[%s1677_s3 + $0x38] sm:$0xff] }
  0x46   :  { %802 = vmatpush.bf16.msra.mxu0 %v1287_v12  ;;  %860 = vmatpush.msra.mxu2 %v853_v33  ;;  %v1299_v12 = vld [vmem:[%s1676_s2] ss:$0 sm:$0xff] }
  0x47   :  { %815 = vmatpush.bf16.msra.mxu1 %v1295_v13 }
  0x48   :  { %861 = vmatpush.msra.mxu2 %v852_v36 }
  0x4a   :  { %803 = vmatpush.bf16.msra.mxu0 %v1286_v14  ;;  %862 = vmatpush.msra.mxu2 %v851_v37 }
  0x4b   :  { %816 = vmatpush.bf16.msra.mxu1 %v1294_v15 }
  0x4c   :  { %863 = vmatpush.msra.mxu2 %v850_v38 }
  0x4e   :  { %804 = vmatpush.bf16.msra.mxu0 %v1285_v16  ;;  %864 = vmatpush.msra.mxu2 %v849_v40  ;;  %v1300_v16 = vld [vmem:[%s1678_s4] ss:$0 sm:$0xff] }
  0x4f   :  { %817 = vmatpush.bf16.msra.mxu1 %v1293_v17 }
  0x50   :  { %865 = vmatpush.msra.mxu2 %v848_v43 }
  0x52   :  { %805 = vmatpush.bf16.msra.mxu0 %v1284_v18  ;;  %866 = vmatpush.msra.mxu2 %v847_v44 }
  0x53   :  { %818 = vmatpush.bf16.msra.mxu1 %v1292_v19 }
  0x54   :  { %867 = vmatpush.msra.mxu2 %v846_v47 }
  0x56   :  { %806 = vmatpush.bf16.msra.mxu0 %v1283_v20  ;;  %868 = vmatpush.msra.mxu2 %v845_v48 }
  0x57   :  { %819 = vmatpush.bf16.msra.mxu1 %v1291_v21 }
  0x58   :  { %869 = vmatpush.msra.mxu2 %v844_v50 }
  0x5a   :  { %807 = vmatpush.bf16.msra.mxu0 %v1282_v22  ;;  %870 = vmatpush.msra.mxu2 %v843_v51 }
  0x5b   :  { %820 = vmatpush.bf16.msra.mxu1 %v1290_v23 }
  0x5c   :  { %871 = vmatpush.msra.mxu2 %v842_v53 }
  0x5e   :  { %808 = vmatpush.bf16.msra.mxu0 %v1281_v24  ;;  %872 = vmatpush.msra.mxu2 %v841_v57 }
  0x5f   :  { %821 = vmatpush.bf16.msra.mxu1 %v1289_v25 }
  0x60   :  { %873 = vmatpush.msra.mxu2 %v840_v59 }
  0x61   :  { %809 = vmatmul.bf16.vlgmr.msra.gmra.mxu0 %v205_v26 }
  0x62   :  { %822 = vmatmul.bf16.vlgmr.msra.gmra.mxu1 %v206_v27  ;;  %874 = vmatpush.msra.mxu2 %v839_v61 }
  0x9e   :  { %v706_v28 = vpop.f32.mrf.mxu0 }
  0x9f   :  { %v719_v29 = vpop.f32.mrf.mxu1 }
  0xa0   :  { %v720_v49 = vadd.f32 %v719_v29, %v706_v28 }
  0xa6   :  { %v732_v30 = vpop.f32.mrf.mxu2  ;;  %v708_v31 = vpop.f32.mrf.mxu0 }
  0xa7   :  { %v745_v34 = vpop.f32.mrf.mxu3  ;;  %v721_v35 = vpop.f32.mrf.mxu1  ;;  %v733_v55 = vadd.f32 %v732_v30, %v720_v49 }
  0xa9   :  { %v746_v60 = vadd.f32 %v745_v34, %v733_v55 }
  0xae   :  { %v734_v39 = vpop.f32.mrf.mxu2 }
  0xaf   :  { %v747_v41 = vpop.f32.mrf.mxu3 }
  0xbe   :  { %v758_v45 = vpop.f32.mrf.mxu0 }
  0xbf   :  { %v771_v46 = vpop.f32.mrf.mxu1  ;;  %v759_v63 = vadd.f32 %v758_v45, %v746_v60 }
  0xc1   :  { %v772_v1 = vadd.f32 %v771_v46, %v759_v63 }
  0xc6   :  { %v784_v52 = vpop.f32.mrf.mxu2  ;;  %v760_v54 = vpop.f32.mrf.mxu0 }
  0xc7   :  { %v773_v56 = vpop.f32.mrf.mxu1  ;;  %v797_v58 = vpop.f32.mrf.mxu3  ;;  %v785_v2 = vadd.f32 %v784_v52, %v772_v1 }
  0xc9   :  { %v798_v3 = vadd.f32 %v797_v58, %v785_v2 }
  0xce   :  { %v786_v62 = vpop.f32.mrf.mxu2 }
  0xcf   :  { %v799_v0 = vpop.f32.mrf.mxu3 }
  0xde   :  { %v810_v4 = vpop.f32.mrf.mxu0 }
  0xdf   :  { %v823_v5 = vpop.f32.mrf.mxu1  ;;  %v811_v6 = vadd.f32 %v810_v4, %v798_v3 }
  0xe1   :  { %v824_v8 = vadd.f32 %v823_v5, %v811_v6 }
  0xe3   :  { %v827_v9 = vadd.f32 %v824_v8, %v30_v7 }
  0xe5   :  { %828 = vst [vmem:[#allocation2] sm:$0x3] %v827_v9 }
  0xe6   :  { %v812_v10 = vpop.f32.mrf.mxu0 }
  0xe7   :  { %v825_v11 = vpop.f32.mrf.mxu1 }
  0xec   :  { %v832_v13 = vld [vmem:[#allocation2] sm:$0x3] }
  0xed   :  { %v837_v14 = vadd.f32 %v1299_v12, %v832_v13 }
  0xef   :  { %v838_v15 = vmax.f32 %v837_v14, 0.0 }
  0xf1   :  { %875 = vmatmul.f32.vlgmr.msra.gmra.mxu2 %v838_v15 }
 0x174   :  { %v876_v17 = vpop.f32.mrf.mxu2 }
 0x175   :  { %v877_v18 = vadd.f32 %v1300_v16, %v876_v17 }
 0x177   :  { %880 = vst.msk [vmem:[#allocation3] sm:$0x3] %vm879_vm0, %v877_v18 }
 0x178   :  { %891 = dma.vmem_to_hbm [thread:$0]  %s887_s11, 32, %s889_s14, [#allocation4]  }
 0x179   :  { %1325 = dma.done.wait [#allocation4], 32  }
 0x17a   :  { %1326 = vsyncadd [#allocation4], 4294967264 }
 0x17b   :  { %896 = vsyncpa [#allocation4], 1 }

</bundles_post_ra>
